<compile_context>
chip_gen: v7x
topology: tpu7x:2x2x1
jax: 0.10.0
libtpu: 0.0.40
codegen_flags: <defaults>
</compile_context>

<pallas_src>
import functools

import jax
import jax.numpy as jnp
from jax import lax
from jax.experimental import pallas as pl
from jax.experimental.pallas import tpu as pltpu


def _round_up(x, m):
    return (x + m - 1) // m * m


def _pick_rows_per_chunk(TH, Wp, target=512):
    """Largest divisor d of TH with d*Wp <= max(Wp, target)."""
    best = 1
    for d in range(1, TH + 1):
        if TH % d == 0 and d * Wp <= max(Wp, target):
            best = d
    return best


def _repconv_kernel(x_hbm, w_ref, b_ref, o_ref, xbuf, sem, *,
                    TH, Wp, rows_per_chunk):
    # x_hbm : (N, (Hp+3)*Wp, C1p) bf16 in HBM (memory_space=pl.ANY)
    # w_ref : (9*C1p, C2p)        bf16 fused 3x3 weights, tap-major rows
    # b_ref : (1, C2p)            f32  fused BN bias (both branches)
    # o_ref : (1, 1, TH*Wp, C2p)  bf16 output tile (row-flattened)
    # xbuf  : (2, (TH+3)*Wp, C1p) bf16 double-buffered halo window
    # sem   : DMA semaphores (2,)
    n = pl.program_id(0)
    h = pl.program_id(1)
    nH = pl.num_programs(1)
    slot = h % 2
    win = (TH + 3) * Wp

    def dma(hh, sl):
        return pltpu.make_async_copy(
            x_hbm.at[n, pl.ds(hh * (TH * Wp), win)], xbuf.at[sl], sem.at[sl])

    # Prime the pipeline at the start of each image's row sweep (keeps the
    # manual pipeline self-contained per n, so the N axis can stay "parallel").
    @pl.when(h == 0)
    def _():
        dma(0, 0).start()

    # Wait for the current window (same transfer size/semaphore as the start).
    dma(0, slot).wait()

    # Prefetch the next window; overlaps with this step's compute.
    @pl.when(h + 1 < nH)
    def _():
        dma(h + 1, 1 - slot).start()

    w = w_ref[...]            # hoisted out of the chunk loop
    b = b_ref[...]
    xb = xbuf.at[slot]        # ref view into the current buffer (no load yet)

    TM = rows_per_chunk * Wp
    for c in range(TH // rows_per_chunk):
        m0 = c * TM
        taps = []
        for dy in range(3):
            for dx in range(3):
                s = m0 + dy * Wp + dx            # constant row offset per tap
                taps.append(xb[s:s + TM, :])     # contiguous (TM, C1p) slice
        patch = jnp.concatenate(taps, axis=-1)   # bounded (TM, 9*C1p) im2col
        acc = jnp.dot(patch, w, preferred_element_type=jnp.float32)
        y = acc + b                              # fused per-channel bias
        y = y * jax.nn.sigmoid(y)                # SiLU (sigmoid -> EUP)
        o_ref[0, 0, m0:m0 + TM, :] = y.astype(o_ref.dtype)


def repconv_forward_nhwc(x_nhwc, w3, w1,
                         gamma1, beta1, mean1, var1,
                         gamma2, beta2, mean2, var2,
                         eps=1e-5, tile_h=8):
    """RepConv.forward (eval mode, k=3, s=1, p=1, g=1, bn=False), NHWC in/out.

    x_nhwc: (N, H, W, C1).  Returns (N, H, W, C2) bf16.
    """
    # TODO(synk): grouped conv (g>1), stride>1 and the optional identity-BN
    #             branch (bn=True) are not implemented (module defaults used).
    N, H, W, C1 = x_nhwc.shape
    C2 = w3.shape[0]
    assert w3.shape == (C2, C1, 3, 3) and w1.shape == (C2, C1, 1, 1)

    f32, bf16 = jnp.float32, jnp.bfloat16
    C1p = _round_up(C1, 128)
    C2p = _round_up(C2, 128)
    TH = tile_h
    Hp = _round_up(H, TH)                 # pad H instead of shrinking TH
    nH = Hp // TH
    Wp = _round_up(W + 2, 8)              # sublane-aligned row pitch
    M = TH * Wp
    rows_per_chunk = _pick_rows_per_chunk(TH, Wp)

    # ---- fuse the two branches (RepVGG reparam) into one 3x3 conv + bias ----
    # (kept in f32; only the final fused tensor is cast to bf16)
    s1 = gamma1 / jnp.sqrt(var1 + eps)
    s2 = gamma2 / jnp.sqrt(var2 + eps)
    bias = (beta1 - mean1 * s1) + (beta2 - mean2 * s2)                 # (C2,)
    w3_f = w3.astype(f32) * s1[:, None, None, None]                    # (C2,C1,3,3)
    w1_f = w1[:, :, 0, 0].astype(f32) * s2[:, None]                    # (C2,C1)
    w_eq = w3_f.at[:, :, 1, 1].add(w1_f)                               # 1x1 -> centre tap

    # (C2,C1,3,3) -> (3,3,C1,C2) -> pad channels -> (9*C1p, C2p), bf16, tap-major
    w_t = jnp.transpose(w_eq, (2, 3, 1, 0))
    w_t = jnp.pad(w_t, ((0, 0), (0, 0), (0, C1p - C1), (0, C2p - C2)))
    w_t = w_t.reshape(9 * C1p, C2p).astype(bf16)
    bias_p = jnp.pad(bias, (0, C2p - C2)).reshape(1, C2p).astype(f32)

    # ---- activation prep: single zero-pad pass, free row-flatten reshape ----
    # H pad (1, Hp-H+2): 1 top halo, Hp-H rows to a full tile, 1 bottom halo,
    # 1 spare row keeping the flattened tap slices in bounds.
    x_pad = jnp.pad(x_nhwc.astype(bf16),
                    ((0, 0), (1, Hp - H + 2), (1, Wp - W - 1), (0, C1p - C1)))
    x_flat = x_pad.reshape(N, (Hp + 3) * Wp, C1p)       # contiguous -> free

    kernel = functools.partial(_repconv_kernel, TH=TH, Wp=Wp,
                               rows_per_chunk=rows_per_chunk)

    cost = pl.CostEstimate(
        flops=2 * N * nH * M * (9 * C1p) * C2p,
        transcendentals=N * nH * M * C2p,
        bytes_accessed=(N * nH * (TH + 3) * Wp * C1p * 2
                        + 9 * C1p * C2p * 2 + C2p * 4
                        + N * nH * M * C2p * 2),
    )

    out_tiles = pl.pallas_call(
        kernel,
        out_shape=jax.ShapeDtypeStruct((N, nH, M, C2p), bf16),
        grid_spec=pltpu.PrefetchScalarGridSpec(
            num_scalar_prefetch=0,
            grid=(N, nH),
            in_specs=[
                pl.BlockSpec(memory_space=pl.ANY),                    # raw HBM, manual DMA
                pl.BlockSpec((9 * C1p, C2p), lambda n, h: (0, 0)),    # fused weights
                pl.BlockSpec((1, C2p), lambda n, h: (0, 0)),          # fused bias
            ],
            out_specs=pl.BlockSpec((1, 1, M, C2p), lambda n, h: (n, h, 0, 0)),
            scratch_shapes=[
                pltpu.VMEM((2, (TH + 3) * Wp, C1p), bf16),   # double-buffered window
                pltpu.SemaphoreType.DMA((2,)),
            ],
        ),
        compiler_params=pltpu.CompilerParams(
            # h must stay sequential (manual DMA pipeline); N can be sharded.
            dimension_semantics=("parallel", "arbitrary"),
            vmem_limit_bytes=64 * 1024 * 1024,
        ),
        cost_estimate=cost,
    )(x_flat, w_t, bias_p)

    # (N, nH, TH*Wp, C2p) -> (N, Hp, Wp, C2p); valid region is [:H, :W, :C2].
    out = out_tiles.reshape(N, Hp, Wp, C2p)[:, :H, :W, :C2]
    return out                                           # NHWC, bf16


def repconv_forward(x_nchw, w3, w1,
                    gamma1, beta1, mean1, var1,
                    gamma2, beta2, mean2, var2,
                    eps=1e-5, tile_h=8):
    """NCHW adapter matching the PyTorch module interface (layout transposes
    exist only here; keep the model NHWC end-to-end to avoid them)."""
    x_nhwc = jnp.transpose(x_nchw, (0, 2, 3, 1))
    y = repconv_forward_nhwc(x_nhwc, w3, w1,
                             gamma1, beta1, mean1, var1,
                             gamma2, beta2, mean2, var2,
                             eps=eps, tile_h=tile_h)
    return jnp.transpose(y, (0, 3, 1, 2))


def _reference(x, w3, w1, g1, b1, m1, v1, g2, b2, m2, v2, eps=1e-5):
    """Pure-JAX f32 reference matching PyTorch RepConv.forward in eval mode."""
    dn = ("NCHW", "OIHW", "NCHW")
    y3 = lax.conv_general_dilated(x, w3, (1, 1), ((1, 1), (1, 1)), dimension_numbers=dn)
    y1 = lax.conv_general_dilated(x, w1, (1, 1), ((0, 0), (0, 0)), dimension_numbers=dn)
    s1 = g1 / jnp.sqrt(v1 + eps)
    s2 = g2 / jnp.sqrt(v2 + eps)
    y = (y3 * s1[None, :, None, None] + (b1 - m1 * s1)[None, :, None, None]
         + y1 * s2[None, :, None, None] + (b2 - m2 * s2)[None, :, None, None])
    return y * jax.nn.sigmoid(y)


if __name__ == "__main__":
    key = jax.random.PRNGKey(0)
    ks = jax.random.split(key, 11)

    N, C1, C2, H, W = 2, 4, 8, 16, 16

    x = jax.random.normal(ks[0], (N, C1, H, W), dtype=jnp.float32)
    # Deterministic synthetic parameters (module __init__ shapes; no checkpoint).
    w3 = 0.1 * jax.random.normal(ks[1], (C2, C1, 3, 3), dtype=jnp.float32)    # conv1.conv.weight
    w1 = 0.1 * jax.random.normal(ks[2], (C2, C1, 1, 1), dtype=jnp.float32)    # conv2.conv.weight
    gamma1 = 1.0 + 0.1 * jax.random.normal(ks[3], (C2,), dtype=jnp.float32)   # conv1.bn.*
    beta1 = 0.1 * jax.random.normal(ks[4], (C2,), dtype=jnp.float32)
    mean1 = 0.1 * jax.random.normal(ks[5], (C2,), dtype=jnp.float32)
    var1 = jnp.abs(1.0 + 0.1 * jax.random.normal(ks[6], (C2,), dtype=jnp.float32))
    gamma2 = 1.0 + 0.1 * jax.random.normal(ks[7], (C2,), dtype=jnp.float32)   # conv2.bn.*
    beta2 = 0.1 * jax.random.normal(ks[8], (C2,), dtype=jnp.float32)
    mean2 = 0.1 * jax.random.normal(ks[9], (C2,), dtype=jnp.float32)
    var2 = jnp.abs(1.0 + 0.1 * jax.random.normal(ks[10], (C2,), dtype=jnp.float32))

    out = repconv_forward(x, w3, w1, gamma1, beta1, mean1, var1,
                          gamma2, beta2, mean2, var2)
    out = jax.block_until_ready(out)

    ref = _reference(x, w3, w1, gamma1, beta1, mean1, var1,
                     gamma2, beta2, mean2, var2)
    assert out.shape == (N, C2, H, W)
    # bf16 matmul inputs + bf16 output store, f32 accumulation -> modest tolerance.
    assert jnp.allclose(out.astype(jnp.float32), ref, atol=5e-2, rtol=5e-2), \
        "mismatch vs reference"

    print("KERNEL_OK")
</pallas_src>

<mosaic_0001>
module attributes {stable_mosaic.version = 11 : i64} {
  func.func @_repconv_kernel(%arg0: i32, %arg1: i32, %arg2: memref<2x456x128xbf16, #tpu.memory_space<any>>, %arg3: memref<1152x128xbf16, #tpu.memory_space<vmem>>, %arg4: memref<1x128xf32, #tpu.memory_space<vmem>>, %arg5: memref<1x1x192x128xbf16, #tpu.memory_space<vmem>>, %arg6: memref<2x264x128xbf16, #tpu.memory_space<vmem>>, %arg7: memref<2x!tpu.dma_semaphore, #tpu.memory_space<semaphore_mem>>) attributes {dimension_semantics = [#tpu.dimension_semantics<parallel>, #tpu.dimension_semantics<arbitrary>], iteration_bounds = array<i64: 2, 2>, scalar_prefetch = 0 : i64, scratch_operands = 2 : i64, tpu.core_type = #tpu.core_type<tc>, window_params = [{}, {pipeline_mode = #tpu.pipeline_mode<synchronous>, transform_indices = @transform_1, window_bounds = array<i64: 1152, 128>}, {pipeline_mode = #tpu.pipeline_mode<synchronous>, transform_indices = @transform_2, window_bounds = array<i64: 1, 128>}, {transform_indices = @transform_3, window_bounds = array<i64: 1, 1, 192, 128>}]} {
    %c2_i32 = arith.constant 2 : i32
    %c0_i32 = arith.constant 0 : i32
    %0 = arith.cmpi eq, %c2_i32, %c0_i32 : i32
    %c1_i32 = arith.constant 1 : i32
    %1 = arith.select %0, %c1_i32, %c2_i32 : i32
    %2 = arith.remsi %arg1, %1 : i32
    %c0_i32_0 = arith.constant 0 : i32
    %3 = arith.cmpi ne, %2, %c0_i32_0 : i32
    %c0_i32_1 = arith.constant 0 : i32
    %4 = arith.cmpi slt, %2, %c0_i32_1 : i32
    %c0_i32_2 = arith.constant 0 : i32
    %5 = arith.cmpi slt, %1, %c0_i32_2 : i32
    %6 = arith.xori %4, %5 : i1
    %7 = arith.andi %6, %3 : i1
    %8 = arith.addi %2, %1 : i32
    %9 = arith.select %7, %8, %2 : i32
    %c0_i32_3 = arith.constant 0 : i32
    %10 = arith.cmpi eq, %arg1, %c0_i32_3 : i32
    %11 = arith.extui %10 : i1 to i32
    %c0_i32_4 = arith.constant 0 : i32
    %12 = arith.cmpi ne, %11, %c0_i32_4 : i32
    scf.if %12 {
      %c0_i32_48 = arith.constant 0 : i32
      %c0_i32_49 = arith.constant 0 : i32
      %c0_i32_50 = arith.constant 0 : i32
      %c0_i32_51 = arith.constant 0 : i32
      %66 = tpu.memref_slice %arg2[%arg0, %c0_i32_50, %c0_i32_51] : memref<2x456x128xbf16, #tpu.memory_space<any>> -> memref<1x264x128xbf16, #tpu.memory_space<any>>
      %67 = tpu.memref_squeeze %66 : memref<1x264x128xbf16, #tpu.memory_space<any>> -> memref<264x128xbf16, #tpu.memory_space<any>>
      %c0_i32_52 = arith.constant 0 : i32
      %c0_i32_53 = arith.constant 0 : i32
      %68 = tpu.memref_slice %arg6[%c0_i32_48, %c0_i32_52, %c0_i32_53] : memref<2x264x128xbf16, #tpu.memory_space<vmem>> -> memref<1x264x128xbf16, #tpu.memory_space<vmem>>
      %69 = tpu.memref_squeeze %68 : memref<1x264x128xbf16, #tpu.memory_space<vmem>> -> memref<264x128xbf16, #tpu.memory_space<vmem>>
      %70 = tpu.memref_slice %arg7[%c0_i32_49] : memref<2x!tpu.dma_semaphore, #tpu.memory_space<semaphore_mem>> -> memref<1x!tpu.dma_semaphore, #tpu.memory_space<semaphore_mem>>
      %71 = tpu.memref_squeeze %70 : memref<1x!tpu.dma_semaphore, #tpu.memory_space<semaphore_mem>> -> memref<!tpu.dma_semaphore, #tpu.memory_space<semaphore_mem>>
      tpu.enqueue_dma source(%67 : memref<264x128xbf16, #tpu.memory_space<any>>) target(%69 : memref<264x128xbf16, #tpu.memory_space<vmem>>) target_semaphore(%71 : memref<!tpu.dma_semaphore, #tpu.memory_space<semaphore_mem>>)
    } else {
    }
    %c0_i32_5 = arith.constant 0 : i32
    %c0_i32_6 = arith.constant 0 : i32
    %13 = tpu.memref_slice %arg2[%arg0, %c0_i32_5, %c0_i32_6] : memref<2x456x128xbf16, #tpu.memory_space<any>> -> memref<1x264x128xbf16, #tpu.memory_space<any>>
    %14 = tpu.memref_squeeze %13 : memref<1x264x128xbf16, #tpu.memory_space<any>> -> memref<264x128xbf16, #tpu.memory_space<any>>
    %c0_i32_7 = arith.constant 0 : i32
    %c0_i32_8 = arith.constant 0 : i32
    %15 = tpu.memref_slice %arg6[%9, %c0_i32_7, %c0_i32_8] : memref<2x264x128xbf16, #tpu.memory_space<vmem>> -> memref<1x264x128xbf16, #tpu.memory_space<vmem>>
    %16 = tpu.memref_squeeze %15 : memref<1x264x128xbf16, #tpu.memory_space<vmem>> -> memref<264x128xbf16, #tpu.memory_space<vmem>>
    %17 = tpu.memref_slice %arg7[%9] : memref<2x!tpu.dma_semaphore, #tpu.memory_space<semaphore_mem>> -> memref<1x!tpu.dma_semaphore, #tpu.memory_space<semaphore_mem>>
    %18 = tpu.memref_squeeze %17 : memref<1x!tpu.dma_semaphore, #tpu.memory_space<semaphore_mem>> -> memref<!tpu.dma_semaphore, #tpu.memory_space<semaphore_mem>>
    tpu.wait_dma2 semaphore(%18 : memref<!tpu.dma_semaphore, #tpu.memory_space<semaphore_mem>>) src(%14 : memref<264x128xbf16, #tpu.memory_space<any>>) dst(%16 : memref<264x128xbf16, #tpu.memory_space<vmem>>)
    %c1_i32_9 = arith.constant 1 : i32
    %19 = arith.addi %arg1, %c1_i32_9 : i32
    %c2_i32_10 = arith.constant 2 : i32
    %20 = arith.cmpi slt, %19, %c2_i32_10 : i32
    %21 = arith.extui %20 : i1 to i32
    %c0_i32_11 = arith.constant 0 : i32
    %22 = arith.cmpi ne, %21, %c0_i32_11 : i32
    scf.if %22 {
      %c1_i32_48 = arith.constant 1 : i32
      %66 = arith.addi %arg1, %c1_i32_48 : i32
      %c1_i32_49 = arith.constant 1 : i32
      %67 = arith.subi %c1_i32_49, %9 : i32
      %c192_i32 = arith.constant 192 : i32
      %68 = arith.muli %66, %c192_i32 : i32
      %c0_i32_50 = arith.constant 0 : i32
      %69 = tpu.memref_slice %arg2[%arg0, %68, %c0_i32_50] : memref<2x456x128xbf16, #tpu.memory_space<any>> -> memref<1x264x128xbf16, #tpu.memory_space<any>>
      %70 = tpu.memref_squeeze %69 : memref<1x264x128xbf16, #tpu.memory_space<any>> -> memref<264x128xbf16, #tpu.memory_space<any>>
      %c0_i32_51 = arith.constant 0 : i32
      %c0_i32_52 = arith.constant 0 : i32
      %71 = tpu.memref_slice %arg6[%67, %c0_i32_51, %c0_i32_52] : memref<2x264x128xbf16, #tpu.memory_space<vmem>> -> memref<1x264x128xbf16, #tpu.memory_space<vmem>>
      %72 = tpu.memref_squeeze %71 : memref<1x264x128xbf16, #tpu.memory_space<vmem>> -> memref<264x128xbf16, #tpu.memory_space<vmem>>
      %73 = tpu.memref_slice %arg7[%67] : memref<2x!tpu.dma_semaphore, #tpu.memory_space<semaphore_mem>> -> memref<1x!tpu.dma_semaphore, #tpu.memory_space<semaphore_mem>>
      %74 = tpu.memref_squeeze %73 : memref<1x!tpu.dma_semaphore, #tpu.memory_space<semaphore_mem>> -> memref<!tpu.dma_semaphore, #tpu.memory_space<semaphore_mem>>
      tpu.enqueue_dma source(%70 : memref<264x128xbf16, #tpu.memory_space<any>>) target(%72 : memref<264x128xbf16, #tpu.memory_space<vmem>>) target_semaphore(%74 : memref<!tpu.dma_semaphore, #tpu.memory_space<semaphore_mem>>)
    } else {
    }
    %c0 = arith.constant 0 : index
    %c0_12 = arith.constant 0 : index
    %23 = vector.load %arg3[%c0, %c0_12] : memref<1152x128xbf16, #tpu.memory_space<vmem>>, vector<1152x128xbf16>
    %c0_13 = arith.constant 0 : index
    %c0_14 = arith.constant 0 : index
    %24 = vector.load %arg4[%c0_13, %c0_14] : memref<1x128xf32, #tpu.memory_space<vmem>>, vector<1x128xf32>
    %c0_i32_15 = arith.constant 0 : i32
    %c0_i32_16 = arith.constant 0 : i32
    %25 = tpu.memref_slice %arg6[%9, %c0_i32_15, %c0_i32_16] : memref<2x264x128xbf16, #tpu.memory_space<vmem>> -> memref<1x264x128xbf16, #tpu.memory_space<vmem>>
    %26 = tpu.memref_squeeze %25 : memref<1x264x128xbf16, #tpu.memory_space<vmem>> -> memref<264x128xbf16, #tpu.memory_space<vmem>>
    %c0_17 = arith.constant 0 : index
    %c0_18 = arith.constant 0 : index
    %27 = vector.load %26[%c0_17, %c0_18] : memref<264x128xbf16, #tpu.memory_space<vmem>>, vector<192x128xbf16>
    %c0_i32_19 = arith.constant 0 : i32
    %c0_i32_20 = arith.constant 0 : i32
    %28 = tpu.memref_slice %arg6[%9, %c0_i32_19, %c0_i32_20] : memref<2x264x128xbf16, #tpu.memory_space<vmem>> -> memref<1x264x128xbf16, #tpu.memory_space<vmem>>
    %29 = tpu.memref_squeeze %28 : memref<1x264x128xbf16, #tpu.memory_space<vmem>> -> memref<264x128xbf16, #tpu.memory_space<vmem>>
    %c1 = arith.constant 1 : index
    %c0_21 = arith.constant 0 : index
    %30 = vector.load %29[%c1, %c0_21] : memref<264x128xbf16, #tpu.memory_space<vmem>>, vector<192x128xbf16>
    %c0_i32_22 = arith.constant 0 : i32
    %c0_i32_23 = arith.constant 0 : i32
    %31 = tpu.memref_slice %arg6[%9, %c0_i32_22, %c0_i32_23] : memref<2x264x128xbf16, #tpu.memory_space<vmem>> -> memref<1x264x128xbf16, #tpu.memory_space<vmem>>
    %32 = tpu.memref_squeeze %31 : memref<1x264x128xbf16, #tpu.memory_space<vmem>> -> memref<264x128xbf16, #tpu.memory_space<vmem>>
    %c2 = arith.constant 2 : index
    %c0_24 = arith.constant 0 : index
    %33 = vector.load %32[%c2, %c0_24] : memref<264x128xbf16, #tpu.memory_space<vmem>>, vector<192x128xbf16>
    %c0_i32_25 = arith.constant 0 : i32
    %c0_i32_26 = arith.constant 0 : i32
    %34 = tpu.memref_slice %arg6[%9, %c0_i32_25, %c0_i32_26] : memref<2x264x128xbf16, #tpu.memory_space<vmem>> -> memref<1x264x128xbf16, #tpu.memory_space<vmem>>
    %35 = tpu.memref_squeeze %34 : memref<1x264x128xbf16, #tpu.memory_space<vmem>> -> memref<264x128xbf16, #tpu.memory_space<vmem>>
    %c24 = arith.constant 24 : index
    %c0_27 = arith.constant 0 : index
    %36 = vector.load %35[%c24, %c0_27] : memref<264x128xbf16, #tpu.memory_space<vmem>>, vector<192x128xbf16>
    %c0_i32_28 = arith.constant 0 : i32
    %c0_i32_29 = arith.constant 0 : i32
    %37 = tpu.memref_slice %arg6[%9, %c0_i32_28, %c0_i32_29] : memref<2x264x128xbf16, #tpu.memory_space<vmem>> -> memref<1x264x128xbf16, #tpu.memory_space<vmem>>
    %38 = tpu.memref_squeeze %37 : memref<1x264x128xbf16, #tpu.memory_space<vmem>> -> memref<264x128xbf16, #tpu.memory_space<vmem>>
    %c25 = arith.constant 25 : index
    %c0_30 = arith.constant 0 : index
    %39 = vector.load %38[%c25, %c0_30] : memref<264x128xbf16, #tpu.memory_space<vmem>>, vector<192x128xbf16>
    %c0_i32_31 = arith.constant 0 : i32
    %c0_i32_32 = arith.constant 0 : i32
    %40 = tpu.memref_slice %arg6[%9, %c0_i32_31, %c0_i32_32] : memref<2x264x128xbf16, #tpu.memory_space<vmem>> -> memref<1x264x128xbf16, #tpu.memory_space<vmem>>
    %41 = tpu.memref_squeeze %40 : memref<1x264x128xbf16, #tpu.memory_space<vmem>> -> memref<264x128xbf16, #tpu.memory_space<vmem>>
    %c26 = arith.constant 26 : index
    %c0_33 = arith.constant 0 : index
    %42 = vector.load %41[%c26, %c0_33] : memref<264x128xbf16, #tpu.memory_space<vmem>>, vector<192x128xbf16>
    %c0_i32_34 = arith.constant 0 : i32
    %c0_i32_35 = arith.constant 0 : i32
    %43 = tpu.memref_slice %arg6[%9, %c0_i32_34, %c0_i32_35] : memref<2x264x128xbf16, #tpu.memory_space<vmem>> -> memref<1x264x128xbf16, #tpu.memory_space<vmem>>
    %44 = tpu.memref_squeeze %43 : memref<1x264x128xbf16, #tpu.memory_space<vmem>> -> memref<264x128xbf16, #tpu.memory_space<vmem>>
    %c48 = arith.constant 48 : index
    %c0_36 = arith.constant 0 : index
    %45 = vector.load %44[%c48, %c0_36] : memref<264x128xbf16, #tpu.memory_space<vmem>>, vector<192x128xbf16>
    %c0_i32_37 = arith.constant 0 : i32
    %c0_i32_38 = arith.constant 0 : i32
    %46 = tpu.memref_slice %arg6[%9, %c0_i32_37, %c0_i32_38] : memref<2x264x128xbf16, #tpu.memory_space<vmem>> -> memref<1x264x128xbf16, #tpu.memory_space<vmem>>
    %47 = tpu.memref_squeeze %46 : memref<1x264x128xbf16, #tpu.memory_space<vmem>> -> memref<264x128xbf16, #tpu.memory_space<vmem>>
    %c49 = arith.constant 49 : index
    %c0_39 = arith.constant 0 : index
    %48 = vector.load %47[%c49, %c0_39] : memref<264x128xbf16, #tpu.memory_space<vmem>>, vector<192x128xbf16>
    %c0_i32_40 = arith.constant 0 : i32
    %c0_i32_41 = arith.constant 0 : i32
    %49 = tpu.memref_slice %arg6[%9, %c0_i32_40, %c0_i32_41] : memref<2x264x128xbf16, #tpu.memory_space<vmem>> -> memref<1x264x128xbf16, #tpu.memory_space<vmem>>
    %50 = tpu.memref_squeeze %49 : memref<1x264x128xbf16, #tpu.memory_space<vmem>> -> memref<264x128xbf16, #tpu.memory_space<vmem>>
    %c50 = arith.constant 50 : index
    %c0_42 = arith.constant 0 : index
    %51 = vector.load %50[%c50, %c0_42] : memref<264x128xbf16, #tpu.memory_space<vmem>>, vector<192x128xbf16>
    %52 = tpu.concatenate %27, %30, %33, %36, %39, %42, %45, %48, %51 in 1 : vector<192x128xbf16>, vector<192x128xbf16>, vector<192x128xbf16>, vector<192x128xbf16>, vector<192x128xbf16>, vector<192x128xbf16>, vector<192x128xbf16>, vector<192x128xbf16>, vector<192x128xbf16> -> vector<192x1152xbf16>
    %cst = arith.constant dense<0.000000e+00> : vector<192x128xf32>
    %53 = tpu.matmul %52, %23, %cst {dimension_numbers = #tpu.dot_dimension_numbers<[1], [0], [0], [1], [0, 0, 1, 1], [], []>} : vector<192x1152xbf16>, vector<1152x128xbf16>, vector<192x128xf32> -> vector<192x128xf32>
    %54 = vector.broadcast %24 : vector<1x128xf32> to vector<192x128xf32>
    %55 = arith.addf %53, %54 : vector<192x128xf32>
    %56 = arith.negf %55 : vector<192x128xf32>
    %57 = math.exp %56 : vector<192x128xf32>
    %cst_43 = arith.constant 1.000000e+00 : f32
    %58 = vector.broadcast %cst_43 : f32 to vector<192x128xf32>
    %59 = arith.addf %58, %57 : vector<192x128xf32>
    %60 = arith.divf %58, %59 : vector<192x128xf32>
    %61 = arith.mulf %55, %60 : vector<192x128xf32>
    %62 = arith.truncf %61 : vector<192x128xf32> to vector<192x128xbf16>
    %c0_44 = arith.constant 0 : index
    %c0_45 = arith.constant 0 : index
    %c0_46 = arith.constant 0 : index
    %c0_47 = arith.constant 0 : index
    %63 = vector.load %arg5[%c0_44, %c0_45, %c0_46, %c0_47] : memref<1x1x192x128xbf16, #tpu.memory_space<vmem>>, vector<1x1x192x128xbf16>
    %64 = vector.shape_cast %63 : vector<1x1x192x128xbf16> to vector<192x128xbf16>
    %65 = vector.shape_cast %62 : vector<192x128xbf16> to vector<1x1x192x128xbf16>
    tpu.vector_store %arg5[%c0_44, %c0_45, %c0_46, %c0_47], %65 {strides = array<i32>} : memref<1x1x192x128xbf16, #tpu.memory_space<vmem>>, vector<1x1x192x128xbf16>,
    return
  }
  func.func @transform_1(%arg0: i32, %arg1: i32) -> (i32, i32) {
    %c0_i32 = arith.constant 0 : i32
    %c0_i32_0 = arith.constant 0 : i32
    %c0_i32_1 = arith.constant 0 : i32
    return %c0_i32, %c0_i32_0 : i32, i32
  }
  func.func @transform_2(%arg0: i32, %arg1: i32) -> (i32, i32) {
    %c0_i32 = arith.constant 0 : i32
    %c0_i32_0 = arith.constant 0 : i32
    %c0_i32_1 = arith.constant 0 : i32
    return %c0_i32, %c0_i32_0 : i32, i32
  }
  func.func @transform_3(%arg0: i32, %arg1: i32) -> (i32, i32, i32, i32) {
    %c0_i32 = arith.constant 0 : i32
    %c0_i32_0 = arith.constant 0 : i32
    %c0_i32_1 = arith.constant 0 : i32
    return %arg0, %arg1, %c0_i32, %c0_i32_0 : i32, i32, i32, i32
  }
}

</mosaic_0001>

<bundles_post_ra>
// kernel: tpu_custom_call.1
= control target key start
LH: loop header
LB: loop body
LE: loop exit
PB: predicated region body
PF: predicated region fallthrough
CT: control target
= control target key end

     0   :  { %8 = vsyncpa [#allocation5], 0  ;;  %s4687_s0 = inlined_call_operand.hbm [shape: bf16[2,456,128], index: 0, kind: input, shape index: {}]   ;;  %s4688_s1 = inlined_call_operand.hbm [shape: bf16[1152,128], index: 1, kind: input, shape index: {}]   ;;  %s4689_s2 = inlined_call_operand.hbm [shape: f32[1,128], index: 2, kind: input, shape index: {}]   ;;  %s4690_s3 = inlined_call_operand.hbm [shape: bf16[2,2,192,128], index: 3, kind: output, shape index: {}]  }
   0x1   :  { %9 = vsyncpa [#allocation8], 0 }
   0x2   :  { %10 = vsyncpa [#allocation6], 0 }
   0x3   :  { %12 = vsyncpa [#allocation6 + $0x1], 0  ;;  %s3646_s12 = smov 0   ;;  %s3648_s13 = smov 0  }
   0x4   :  { %s3650_s14 = smov 0   ;;  %s3652_s15 = smov 0  }
   0x5   :  { %s3654_s16 = smov 0   ;;  %s3656_s17 = smov 0  }
   0x6   :  { %s3658_s18 = smov 0   ;;  %s3660_s19 = smov 0  }
   0x7 LB: > { %4707 = sst [smem:[#allocation20_spill]] %s3612_s18  ;;  %s2391_s20 = sadd.s32 4294967295, %s3616_s19   ;;  %s3616_s19 = sphi %s3660_s19, %s18_s19   ;;  %s3612_s18 = sphi %s3658_s18, %s4739_s18   ;;  %s3608_s17 = sphi %s3656_s17, %s4744_s17   ;;  %s3604_s16 = sphi %s3654_s16, %s4737_s16   ;;  %s3600_s15 = sphi %s3652_s15, %s4743_s15   ;;  %s3596_s14 = sphi %s3650_s14, %s4742_s14   ;;  %s3592_s13 = sphi %s3648_s13, %s4741_s13   ;;  %s3588_s12 = sphi %s3646_s12, %s4740_s12  }
   0x8   : > { %s2392_s21 = sadd.s32 4294967294, %s3616_s19   ;;  %s27_s22 = sadd.s32 1, %s3608_s17 }
   0x9   : > { %s30_s23 = sadd.s32 1, %s3612_s18  ;;  %p28_p0 = scmp.ge.s32.totalorder %s27_s22, 2 }
   0xa   : > { %s81_s24 = sadd.s32 1, %s3596_s14  ;;  %p91_p1 = scmp.ne.s32.totalorder %s3596_s14, %s3592_s13 }
   0xb   : > { %p92_p2 = scmp.eq.s32.totalorder %s2391_s20, 3  ;;  %s4746_s22 = smov (%p28_p0, %s27_s22), 0 }
   0xc   : > { %4708 = sst [smem:[#allocation21_spill]] %s4746_s22  ;;  %s4748_s23 = smov (!%p28_p0, %s30_s23), %s3612_s18 }
   0xd   : > { %s77_s25 = ssub.s32 %s3608_s17, %s4746_s22  ;;  %p3698_p3 = por %p92_p2, %p91_p1 }
   0xe   : > { %p32_p4 = scmp.ge.s32.totalorder %s4748_s23, 2  ;;  %p97_p5 = scmp.ne.s32.totalorder %s3592_s13, %s3588_s12 }
   0xf   : > { %s4709_s26 = scalar_select %p3698_p3, 1, 0 }
  0x10   : > { %p98_p6 = scmp.eq.s32.totalorder %s2392_s21, 3  ;;  %p2393_p7 = scmp.ge.s32.totalorder %s3616_s19, 1 }
  0x11   : > { %s4750_s23 = smov (%p32_p4, %s4748_s23), 0  ;;  %p105_p9 = scmp.lt.s32.totalorder %s3616_s19, 5 }
  0x12   : > { %4710 = sst [smem:[#allocation22_spill]] %s4750_s23  ;;  %p3707_p8 = por %p98_p6, %p97_p5 }
  0x13   : > { %s76_s28 = ssub.s32 %s3612_s18, %s4750_s23  ;;  %p3714_p10 = pnand %p2393_p7, %p105_p9 }
  0x14   : > { %s4711_s27 = scalar_select %p3707_p8, 1, 0 }
  0x15   : > { %s78_s29 = sor.u32 %s77_s25, %s76_s28  ;;  %p3718_p12 = scmp.eq.s32.totalorder %s2391_s20, 0 }
  0x16   : > { %s4712_s30 = scalar_select %p3714_p10, 1, 0 }
  0x17   : > { %p79_p11 = scmp.eq.s32.totalorder %s78_s29, 0  ;;  %p3110_p13 = pneg %p3714_p10 }
  0x18   : > { %s4713_s4 = scalar_select %p3718_p12, 1, 0 }
  0x19   : > { %s3725_s5 = scalar_select %p79_p11, %s3596_s14, %s81_s24  }
  0x1a   : > { %s3618_s6 = smov [#allocation4]   ;;  %p3729_p0 = pnand %p3718_p12, %p3110_p13 }
  0x1b   : > { %s117_s7 = sshll.u32 %s3618_s6, 4  ;;  %s3400_s11 = scalar_lea.hbm %s4688_s1, 9216  ;;  %s118_s7 = int_to_ptr.vmem [resolvable:$true] %s117_s7 }
  0x1c   : > { %p3401_p1 = scmp.ne.s32.totalorder %s4688_s1, %s3400_s11  ;;  %p3402_p2 = pneg %p3729_p0 }
  0x1d   : > { %p3407_p6 = scmp.lt.u32.totalorder %s3400_s11, %s4688_s1 }
  0x1e   : > { %p3403_p4 = pnand %p3402_p2, %p3401_p1 }
  0x20   : > { %p3404_p5 = pneg %p3403_p4 }
  0x22   : > { %p3409_p7 = pnand %p3407_p6, %p3404_p5 }
  0x24   : > { %3412 = shalt.err (!%p3409_p7)
}
  0x25   : > { %s3413_s28 = scalar_lea.vmem %s118_s7, 9216  ;;  %p3421_p8 = scmp.lt.s32.totalorder %s118_s7, %s118_s7 }
  0x26   : > { %p3414_p9 = scmp.ne.s32.totalorder %s118_s7, %s3413_s28  ;;  %p3422_p3 = scmp.lt.s32.totalorder %s3413_s28, %s3413_s28 }
  0x28   : > { %p3416_p11 = pnand %p3414_p9, %p3402_p2  ;;  %p3423_p12 = por %p3422_p3, %p3421_p8 }
  0x2a   : > { %p3417_p13 = pneg %p3416_p11 }
  0x2c   : > { %p3424_p10 = pnand %p3423_p12, %p3417_p13 }
  0x2e   : > { %3427 = shalt.err (!%p3424_p10)
}
  0x2f   : > { %s3619_s29 = smov 64   ;;  %s3620_s6 = smov 4  }
  0x30   : > { %3113 = dma.hbm_to_vmem [thread:$0]  (!%p3729_p0), %s4688_s1, 9216, %s118_s7, [#allocation5], %s3619_s29, %s3619_s29, %s3620_s6  }
  0x31   : > { %s3621_s11 = smov [#allocation7]   ;;  %s3428_s25 = scalar_lea.hbm %s4689_s2, 16 }
  0x32   : > { %s131_s20 = sshll.u32 %s3621_s11, 4  ;;  %p3429_p3 = scmp.ne.s32.totalorder %s4689_s2, %s3428_s25  ;;  %s132_s20 = int_to_ptr.vmem [resolvable:$true] %s131_s20 }
  0x33   : > { %p3435_p12 = scmp.lt.u32.totalorder %s3428_s25, %s4689_s2 }
  0x34   : > { %p3431_p8 = pnand %p3429_p3, %p3402_p2 }
  0x36   : > { %p3432_p10 = pneg %p3431_p8 }
  0x38   : > { %p3437_p1 = pnand %p3435_p12, %p3432_p10 }
  0x3a   : > { %3440 = shalt.err (!%p3437_p1)
}
  0x3b   : > { %s3441_s7 = scalar_lea.vmem %s132_s20, 16  ;;  %s3448_s29 = scalar_lea.vmem %s132_s20, 32 }
  0x3c   : > { %p3442_p4 = scmp.ne.s32.totalorder %s132_s20, %s3441_s7  ;;  %p3449_p7 = scmp.lt.s32.totalorder %s132_s20, %s132_s20 }
  0x3d   : > { %p3450_p9 = scmp.lt.s32.totalorder %s3448_s29, %s3441_s7 }
  0x3e   : > { %p3444_p5 = pnand %p3442_p4, %p3402_p2 }
  0x3f   : > { %p3451_p11 = por %p3450_p9, %p3449_p7 }
  0x40   : > { %p3445_p6 = pneg %p3444_p5 }
  0x42   : > { %p3452_p13 = pnand %p3451_p11, %p3445_p6 }
  0x44   : > { %3455 = shalt.err (!%p3452_p13)
}
  0x45   : > { %3116 = dma.hbm_to_vmem [thread:$0]  (!%p3729_p0), %s4689_s2, 16, %s132_s20, [#allocation8]  }
  0x46   : > { %p4715_p3 = scmp.ne.s32.totalorder %s4712_s30, 0 }
  0x48   : > { %144 = sbr.rel (%p4715_p3) target bundleno = 666 (0x29a), region = 28 }
  0x4f   : > { %p4716_p8 = scmp.ne.s32.totalorder %s4713_s4, 0 }
  0x51   : > { %3573 = dma.done.wait (%p4716_p8), [#allocation5], 9216  }
  0x52   : > { %3575 = vsyncadd (%p4716_p8), [#allocation5], 4294958080 }
  0x53   : > { %3577 = dma.done.wait (%p4716_p8), [#allocation8], 16  }
  0x54   : > { %3579 = vsyncadd (%p4716_p8), [#allocation8], 4294967280  ;;  %s4698_s22 = sand.u32 1, %s3592_s13   ;;  %p166_p0 = scmp.lt.s32.totalorder %s3600_s15, 0 }
  0x55   : > { %s3789_s30 = smul.u32 96, %s4698_s22  ;;  %s167_s8 = ssub.s32 0, %s3600_s15 }
  0x56   : > { %s2399_s6 = smin.u32 %s3600_s15, %s167_s8  ;;  %p3125_p2 = scmp.eq.s32.totalorder %s3600_s15, 0 }
  0x57   : > { %s169_s9 = sand.u32 1, %s2399_s6   ;;  %s2567_s4 = smul.u32 3648, %s3604_s16 }
  0x58   : > { %s170_s10 = ssub.s32 0, %s169_s9  ;;  %s3622_s25 = smov [#allocation2]  }
  0x59   : > { %s4752_s10 = smov (!%p166_p0, %s170_s10), %s169_s9  ;;  %s184_s24 = scalar_lea.hbm %s4687_s0, %s2567_s4 }
  0x5a   : > { %p2401_p10 = scmp.lt.s32.totalorder %s4752_s10, 0  ;;  %s176_s11 = sadd.s32 2, %s4752_s10 }
  0x5b   : > { %s192_s28 = sshll.u32 %s3622_s25, 4  ;;  %s3456_s7 = scalar_lea.hbm %s184_s24, 2112  ;;  %s3800_s28 = int_to_ptr.vmem [resolvable:$true] %s192_s28 }
  0x5c   : > { %s4754_s11 = smov (!%p2401_p10, %s176_s11), %s4752_s10  ;;  %p3457_p12 = scmp.ne.s32.totalorder %s184_s24, %s3456_s7 }
  0x5d   : > { %s4700_s18 = scalar_lea.hbm %s4687_s0, 7296  ;;  %p3461_p5 = scmp.lt.u32.totalorder %s184_s24, %s4687_s0 }
  0x5e   : > { %p3458_p1 = pnand %p3457_p12, %p3125_p2  ;;  %p3462_p6 = scmp.lt.u32.totalorder %s4700_s18, %s3456_s7 }
  0x5f   : > { %p3464_p9 = scmp.lt.u32.totalorder %s3456_s7, %s184_s24 }
  0x60   : > { %p3459_p4 = pneg %p3458_p1  ;;  %p3463_p7 = por %p3462_p6, %p3461_p5 }
  0x62   : > { %p3465_p11 = por %p3464_p9, %p3463_p7 }
  0x64   : > { %p3466_p13 = pnand %p3465_p11, %p3459_p4 }
  0x66   : > { %3469 = shalt.err (!%p3466_p13)  }
  0x67   : > { %s3470_s10 = scalar_lea.vmem %s3800_s28, 2112  ;;  %s4699_s20 = scalar_lea.vmem %s3800_s28, 4224 }
  0x68   : > { %p3471_p3 = scmp.ne.s32.totalorder %s3800_s28, %s3470_s10  ;;  %p3477_p10 = scmp.lt.s32.totalorder %s3800_s28, %s3800_s28 }
  0x69   : > { %p3478_p12 = scmp.lt.s32.totalorder %s4699_s20, %s3470_s10 }
  0x6a   : > { %p3472_p8 = pnand %p3471_p3, %p3125_p2 }
  0x6b   : > { %p3479_p1 = por %p3478_p12, %p3477_p10 }
  0x6c   : > { %p3473_p0 = pneg %p3472_p8 }
  0x6e   : > { %p3480_p5 = pnand %p3479_p1, %p3473_p0 }
  0x70   : > { %3483 = shalt.err (!%p3480_p5)  }
  0x71   : > { %3105 = dma.hbm_to_vmem [thread:$0]  (%p3125_p2), %s184_s24, 2112, %s3800_s28, [#allocation3] }
  0x72   : > { %s2568_s21 = smul.u32 132, %s4754_s11  ;;  %s3828_s25 = scalar_lea.vmem [#allocation9], %s3789_s30 }
  0x73   : > { %s199_s29 = scalar_lea.sflag [#allocation3], %s4754_s11 }
  0x74   : > { %s3830_s7 = scalar_lea.vmem [#allocation2], %s2568_s21 }
  0x75   : > { %3580 = dma.done.wait %s199_s29, 2112 }
  0x76   : > { %3581 = vsyncadd %s199_s29, 4294965184  ;;  %s204_s23 = sadd.s32 1, %s3600_s15  ;;  %s209_s8 = ssub.s32 1, %s4754_s11  ;;  %v3199_v0 = vld [vmem:[#allocation4 + $0x40] sm:$0xff]  }
  0x77   : > { %s210_s6 = smul.u32 192, %s204_s23  ;;  %p3835_p4 = scmp.lt.s32.totalorder %s204_s23, 2  ;;  %v3200_v1 = vld [vmem:[#allocation4 + $0xc0] sm:$0xff]   ;;  %2665 = vmatprep.subr.bf16.mxu0 %v3199_v0 }
  0x78   : > { %s213_s4 = smul.u32 57, %s3604_s16  ;;  %v3201_v2 = vld [vmem:[#allocation4] sm:$0xff]  }
  0x79   : > { %s211_s24 = sshra.s32 %s210_s6, 3  ;;  %s2569_s30 = smul.u32 132, %s209_s8 }
  0x7a   : > { %s214_s10 = sadd.s32 %s213_s4, %s211_s24  ;;  %s220_s6 = scalar_lea.sflag [#allocation3], %s209_s8 }
  0x7b   : > { %s2406_s21 = sshll.u32 %s214_s10, 6  ;;  %s219_s11 = scalar_lea.vmem [#allocation2], %s2569_s30 }
  0x7c   : > { %s3843_s29 = scalar_lea.hbm %s4687_s0, %s2406_s21  ;;  %s228_s23 = sshll.u32 %s219_s11, 4  ;;  %s229_s23 = int_to_ptr.vmem [resolvable:$true] %s228_s23 }
  0x7d   : > { %s3484_s18 = scalar_lea.hbm %s3843_s29, 2112  ;;  %p3489_p9 = scmp.lt.u32.totalorder %s3843_s29, %s4687_s0 }
  0x7e   : > { %p3485_p2 = scmp.ne.s32.totalorder %s3843_s29, %s3484_s18  ;;  %s4718_s10 = scalar_lea.hbm %s4687_s0, 7296 }
  0x7f   : > { %p3490_p11 = scmp.lt.u32.totalorder %s4718_s10, %s3484_s18  ;;  %p3492_p3 = scmp.lt.u32.totalorder %s3484_s18, %s3843_s29 }
  0x80   : > { %p3486_p6 = pnand %p3485_p2, %p3835_p4 }
  0x81   : > { %p3491_p13 = por %p3490_p11, %p3489_p9 }
  0x82   : > { %p3487_p7 = pneg %p3486_p6 }
  0x83   : > { %p3493_p8 = por %p3492_p3, %p3491_p13 }
  0x85   : > { %p3494_p0 = pnand %p3493_p8, %p3487_p7 }
  0x87   : > { %3497 = shalt.err (!%p3494_p0)  }
  0x88   : > { %s3498_s8 = scalar_lea.vmem %s229_s23, 2112  ;;  %p3505_p5 = scmp.lt.s32.totalorder %s229_s23, %s3800_s28 }
  0x89   : > { %p3499_p10 = scmp.ne.s32.totalorder %s229_s23, %s3498_s8  ;;  %s4719_s30 = scalar_lea.vmem %s3800_s28, 4224 }
  0x8a   : > { %p3506_p2 = scmp.lt.s32.totalorder %s4719_s30, %s3498_s8 }
  0x8b   : > { %p3500_p12 = pnand %p3499_p10, %p3835_p4 }
  0x8c   : > { %p3507_p6 = por %p3506_p2, %p3505_p5 }
  0x8d   : > { %p3501_p1 = pneg %p3500_p12 }
  0x8f   : > { %p3508_p9 = pnand %p3507_p6, %p3501_p1 }
  0x91   : > { %3511 = shalt.err (!%p3508_p9)  }
  0x92   : > { %3107 = dma.hbm_to_vmem [thread:$0]  (%p3835_p4), %s3843_s29, 2112, %s229_s23, %s220_s6  ;;  %2753 = vmatprep.subr.bf16.mxu1 %v3200_v1  ;;  %v3202_v3 = vld [vmem:[#allocation4 + $0x80] sm:$0xff]   ;;  %2666 = vmatpush3.bf16.msra.mxu0 %v3201_v2  ;;  %v3203_v4 = vld [vmem:[#allocation4 + $0x48] sm:$0xff]   ;;  %v3207_v8 = vld [vmem:[#allocation4 + $0x50] sm:$0xff]   ;;  %vm488_vm0 = vsmask.f32 7424 }
  0x93   : > { %2754 = vmatpush3.bf16.msra.mxu1 %v3202_v3  ;;  %v3204_v5 = vld [vmem:[#allocation4 + $0xc8] sm:$0xff]   ;;  %2667 = vmatprep.subr.bf16.mxu0 %v3203_v4  ;;  %v3208_v9 = vld [vmem:[#allocation4 + $0xd0] sm:$0xff]   ;;  %v3211_v12 = vld [vmem:[#allocation4 + $0x58] sm:$0xff]   ;;  %vm604_vm1 = vcmask 1046528   ;;  %s3094_s28 = smul.u32 24, %s3600_s15  ;;  %s4734_s11 = sand.u32 1, %s3592_s13  }
  0x94   : > { %v3205_v6 = vld [vmem:[#allocation4 + $0x8] sm:$0xff]   ;;  %2755 = vmatprep.subr.bf16.mxu1 %v3204_v5  ;;  %v3209_v10 = vld [vmem:[#allocation4 + $0x10] sm:$0xff]   ;;  %v3212_v13 = vld [vmem:[#allocation4 + $0xd8] sm:$0xff]   ;;  %s3095_s18 = smul.u32 48, %s3604_s16  ;;  %s2280_s16 = sshll.u32 %s3828_s25, 4  ;;  %s4629_s16 = int_to_ptr.vmem [resolvable:$true] %s2280_s16 }
  0x95   : > { %v3206_v7 = vld [vmem:[#allocation4 + $0x88] sm:$0xff]   ;;  %v3210_v11 = vld [vmem:[#allocation4 + $0x90] sm:$0xff]   ;;  %v3213_v14 = vld [vmem:[#allocation4 + $0x18] sm:$0xff]   ;;  %s4635_s23 = scalar_lea.sflag [#allocation6], %s4734_s11  ;;  %s3512_s6 = scalar_lea.vmem %s4629_s16, 1536 }
  0x96   : > { %2668 = vmatpush3.bf16.msra.mxu0 %v3205_v6  ;;  %v3214_v15 = vld [vmem:[#allocation4 + $0x98] sm:$0xff]   ;;  %v3215_v16 = vld [vmem:[#allocation4 + $0x60] sm:$0xff]   ;;  %v3219_v20 = vld [vmem:[#allocation4 + $0x68] sm:$0xff]   ;;  %p3513_p4 = scmp.ne.s32.totalorder %s4629_s16, %s3512_s6  ;;  %p4735_p7 = scmp.ne.s32.totalorder %s4709_s26, 0 }
  0x97   : > { %2756 = vmatpush3.bf16.msra.mxu1 %v3206_v7  ;;  %2669 = vmatprep.subr.bf16.mxu0 %v3207_v8  ;;  %v3216_v17 = vld [vmem:[#allocation4 + $0xe0] sm:$0xff]   ;;  %v3220_v21 = vld [vmem:[#allocation4 + $0xe8] sm:$0xff]   ;;  %v3223_v24 = vld [vmem:[#allocation4 + $0x70] sm:$0xff]   ;;  %s3623_s4 = smov [#allocation9]  }
  0x98   : > { %2757 = vmatprep.subr.bf16.mxu1 %v3208_v9  ;;  %v3217_v18 = vld [vmem:[#allocation4 + $0x20] sm:$0xff]   ;;  %v3221_v22 = vld [vmem:[#allocation4 + $0x28] sm:$0xff]   ;;  %v3224_v25 = vld [vmem:[#allocation4 + $0xf0] sm:$0xff]   ;;  %p3514_p11 = pnand %p3513_p4, %p4735_p7  ;;  %s3516_s22 = sshll.u32 %s3623_s4, 4  ;;  %s3517_s22 = int_to_ptr.vmem [resolvable:$false] %s3516_s22 }
  0x99   : > { %v3218_v19 = vld [vmem:[#allocation4 + $0xa0] sm:$0xff]   ;;  %v3222_v23 = vld [vmem:[#allocation4 + $0xa8] sm:$0xff]   ;;  %v3225_v26 = vld [vmem:[#allocation4 + $0x30] sm:$0xff]   ;;  %s3518_s20 = scalar_lea.vmem %s3517_s22, 3072  ;;  %p3519_p3 = scmp.lt.s32.totalorder %s4629_s16, %s3517_s22 }
  0x9a   : > { %2670 = vmatpush3.bf16.msra.mxu0 %v3209_v10  ;;  %v3226_v27 = vld [vmem:[#allocation4 + $0xb0] sm:$0xff]   ;;  %v3227_v28 = vld [vmem:[#allocation4 + $0x78] sm:$0xff]   ;;  %v379_v34 = vld [vmem:[%s3830_s7 + $0x8] sm:$0xf]  ;;  %p3515_p13 = pneg %p3514_p11  ;;  %p3520_p8 = scmp.lt.s32.totalorder %s3518_s20, %s3512_s6 }
  0x9b   : > { %2758 = vmatpush3.bf16.msra.mxu1 %v3210_v11  ;;  %2671 = vmatprep.subr.bf16.mxu0 %v3211_v12  ;;  %v3228_v29 = vld [vmem:[#allocation4 + $0xf8] sm:$0xff]   ;;  %v380_v35 = vld [vmem:[%s3830_s7 + $0xc] sm:$0xf]  ;;  %v3871_v37 = vld [vmem:[%s3830_s7 + $0x10] sm:$0xf] }
  0x9c   : > { %2759 = vmatprep.subr.bf16.mxu1 %v3212_v13  ;;  %v3229_v30 = vld [vmem:[#allocation4 + $0x38] sm:$0xff]   ;;  %v382_v38 = vld [vmem:[%s3830_s7 + $0x14] sm:$0xf]  ;;  %v3874_v39 = vcombine.low %v379_v34, %v380_v35  ;;  %v3877_v40 = vcombine.low %v380_v35, %v3871_v37  ;;  %v3236_v46 = vld [vmem:[#allocation4 + $0x140] sm:$0xff]   ;;  %p3521_p0 = por %p3520_p8, %p3519_p3 }
  0x9d   : > { %v3230_v31 = vld [vmem:[#allocation4 + $0xb8] sm:$0xff]   ;;  %v3881_v44 = vcombine.low %v3871_v37, %v382_v38  ;;  %v3237_v47 = vld [vmem:[#allocation4 + $0x1c0] sm:$0xff]   ;;  %v383_v59 = vld [vmem:[%s3830_s7 + $0x18] sm:$0xf] }
  0x9e   : > { %2672 = vmatpush3.bf16.msra.mxu0 %v3213_v14  ;;  %v377_v32 = vld [vmem:[%s3830_s7] sm:$0xf]  ;;  %v378_v33 = vld [vmem:[%s3830_s7 + $0x4] sm:$0xf]  ;;  %v497_v48 = vshll.u32 %v3874_v39, 16  ;;  %1492 = vmatprep.mubr.bf16.mxu1 %v3877_v40  ;;  %v606_v49 = vrot.slane %v3874_v39, 1  ;;  %v3893_v61 = vcombine.low %v382_v38, %v383_v59  ;;  %p3522_p10 = pnand %p3521_p0, %p3515_p13 }
  0x9f   : > { %2760 = vmatpush3.bf16.msra.mxu1 %v3214_v15  ;;  %2673 = vmatprep.subr.bf16.mxu0 %v3215_v16  ;;  %v2408_v36 = vcombine.low %v377_v32, %v378_v33  ;;  %v402_v41 = vld [vmem:[%s3830_s7] sm:$0xe]  ;;  %v3238_v53 = vld [vmem:[#allocation4 + $0x100] sm:$0xff]   ;;  %v501_v57 = vshrl.u32 %v3874_v39, 16  ;;  %v505_v58 = vshll.u32 %v3881_v44, 16  ;;  %v608_v62 = vrot.slane %v3881_v44, 1 }
  0xa0   : > { %2761 = vmatprep.subr.bf16.mxu1 %v3216_v17  ;;  %v2421_v45 = vcombine.low %v402_v41, %v378_v33  ;;  %v499_v52 = vrot.slane %v497_v48, 1  ;;  %v3239_v54 = vld [vmem:[#allocation4 + $0x180] sm:$0xff]   ;;  %v3891_v60 = vld [vmem:[%s3830_s7 + $0x1c] sm:$0xf]  ;;  %v3242_v63 = vld [vmem:[#allocation4 + $0x148] sm:$0xff]   ;;  %v509_v7 = vshrl.u32 %v3881_v44, 16 }
  0xa1   : > { %v490_v42 = vshrl.u32 %v2408_v36, 16  ;;  %v492_v43 = vshll.u32 %v2408_v36, 16  ;;  %v507_v2 = vrot.slane %v505_v58, 1  ;;  %v3898_v3 = vcombine.low %v383_v59, %v3891_v60  ;;  %v3243_v4 = vld [vmem:[#allocation4 + $0x1c8] sm:$0xff]   ;;  %v385_v10 = vld [vmem:[%s3830_s7 + $0x20] sm:$0xf] }
  0xa2   : > { %2674 = vmatpush3.bf16.msra.mxu0 %v3217_v18  ;;  %v605_v51 = vrot.slane %v2421_v45, 1  ;;  %v503_v1 = vor.u32 %v501_v57, %v499_v52  ;;  %v3244_v6 = vld [vmem:[#allocation4 + $0x108] sm:$0xff]   ;;  %v386_v11 = vld [vmem:[%s3830_s7 + $0x24] sm:$0xf]  ;;  %v609_v12 = vsel %vm604_vm1, %v606_v49, %v608_v62  ;;  %v3910_v15 = vcombine.low %v3891_v60, %v385_v10  ;;  %v3250_v16 = vld [vmem:[#allocation4 + $0x150] sm:$0xff]  }
  0xa3   : > { %2762 = vmatpush3.bf16.msra.mxu1 %v3218_v19  ;;  %2675 = vmatprep.subr.bf16.mxu0 %v3219_v20  ;;  %v494_v50 = vrot.slane %v492_v43, 1  ;;  %v3245_v8 = vld [vmem:[#allocation4 + $0x188] sm:$0xff]   ;;  %v513_v9 = vshll.u32 %v3898_v3, 16  ;;  %v511_v13 = vor.u32 %v509_v7, %v507_v2  ;;  %v3907_v14 = vcombine.low %v385_v10, %v386_v11  ;;  %v3257_v34 = vld [vmem:[#allocation4 + $0x1d8] sm:$0xff]  }
  0xa4   : > { %2763 = vmatprep.subr.bf16.mxu1 %v3220_v21  ;;  %v607_v56 = vsel %vm604_vm1, %v605_v51, %v606_v49  ;;  %v508_v5 = vsel %vm488_vm0, %v503_v1, %v507_v2  ;;  %v610_v18 = vrot.slane %v3898_v3, 1  ;;  %v388_v19 = vld [vmem:[%s3830_s7 + $0x2c] sm:$0xf]  ;;  %v517_v20 = vshrl.u32 %v3898_v3, 16  ;;  %v3251_v21 = vld [vmem:[#allocation4 + $0x1d0] sm:$0xff]  }
  0xa5   : > { %v495_v55 = vor.u32 %v494_v50, %v490_v42  ;;  %v515_v17 = vrot.slane %v513_v9, 1  ;;  %v676_v35 = vshrl.u32 %v3877_v40, 16  ;;  %v678_v38 = vshll.u32 %v3877_v40, 16  ;;  %v3259_v42 = vld [vmem:[#allocation4 + $0x198] sm:$0xff]   ;;  %v389_v45 = vld [vmem:[%s3830_s7 + $0x30] sm:$0xf] }
  0xa6   : > { %2676 = vmatpush3.bf16.msra.mxu0 %v3221_v22  ;;  %v525_v41 = vshrl.u32 %v3907_v14, 16  ;;  %v3935_v43 = vld [vmem:[%s3830_s7 + $0x3c] sm:$0xf]  ;;  %v3264_v51 = vld [vmem:[#allocation4 + $0x160] sm:$0xff]   ;;  %v3962_v58 = vcombine.low %v388_v19, %v389_v45 }
  0xa7   : > { %2764 = vmatpush3.bf16.msra.mxu1 %v3222_v23  ;;  %2677 = vmatprep.subr.bf16.mxu0 %v3223_v24  ;;  %v500_v0 = vsel %vm488_vm0, %v495_v55, %v499_v52  ;;  %v516_v22 = vsel %vm488_vm0, %v511_v13, %v515_v17  ;;  %v521_v23 = vshll.u32 %v3907_v14, 16  ;;  %v3252_v24 = vld [vmem:[#allocation4 + $0x110] sm:$0xff]   ;;  %v3265_v55 = vld [vmem:[#allocation4 + $0x1e0] sm:$0xff]  }
  0xa8   : > { %2765 = vmatprep.subr.bf16.mxu1 %v3224_v25  ;;  %1363 = vmatprep.mubr.bf16.mxu0 %v500_v0  ;;  %v387_v25 = vld [vmem:[%s3830_s7 + $0x28] sm:$0xf] }
  0xa9   : > { %v523_v32 = vrot.slane %v521_v23, 1  ;;  %v3926_v33 = vcombine.low %v386_v11, %v387_v25  ;;  %v3267_v2 = vld [vmem:[#allocation4 + $0x1a0] sm:$0xff]   ;;  %v3272_v11 = vld [vmem:[#allocation4 + $0x128] sm:$0xff]   ;;  %v3991_v23 = vld [vmem:[%s3830_s7 + $0x5c] sm:$0xf] }
  0xaa   : > { %2678 = vmatpush3.bf16.msra.mxu0 %v3225_v26  ;;  %v3253_v26 = vld [vmem:[#allocation4 + $0x190] sm:$0xff]  }
  0xab   : > { %2766 = vmatpush3.bf16.msra.mxu1 %v3226_v27  ;;  %2679 = vmatprep.subr.bf16.mxu0 %v3227_v28  ;;  %v3256_v27 = vld [vmem:[#allocation4 + $0x158] sm:$0xff]   ;;  %v3920_v28 = vcombine.low %v387_v25, %v388_v19  ;;  %v527_v57 = vor.u32 %v525_v41, %v523_v32  ;;  %v3278_v25 = vld [vmem:[#allocation4 + $0x170] sm:$0xff]  }
  0xac   : > { %2767 = vmatprep.subr.bf16.mxu1 %v3228_v29  ;;  %v3923_v29 = vld [vmem:[%s3830_s7 + $0x34] sm:$0xf] }
  0xad   : > { %v529_v49 = vshll.u32 %v3920_v28, 16  ;;  %v3948_v50 = vcombine.low %v389_v45, %v3923_v29  ;;  %v614_v0 = vrot.slane %v3920_v28, 1  ;;  %v3280_v45 = vld [vmem:[#allocation4 + $0x130] sm:$0xff]  }
  0xae   : > { %2680 = vmatpush3.bf16.msra.mxu0 %v3229_v30  ;;  %v611_v30 = vsel %vm604_vm1, %v608_v62, %v610_v18  ;;  %v3266_v62 = vld [vmem:[#allocation4 + $0x120] sm:$0xff]  }
  0xaf   : > { %2768 = vmatpush3.bf16.msra.mxu1 %v3230_v31  ;;  %2841 = vmatprep.subr.bf16.mxu0 %v3236_v46  ;;  %v519_v31 = vor.u32 %v517_v20, %v515_v17  ;;  %v391_v46 = vld [vmem:[%s3830_s7 + $0x38] sm:$0xf]  ;;  %v537_v1 = vshll.u32 %v3948_v50, 16  ;;  %v616_v10 = vrot.slane %v3948_v50, 1  ;;  %v541_v13 = vshrl.u32 %v3948_v50, 16  ;;  %v3273_v17 = vld [vmem:[#allocation4 + $0x1a8] sm:$0xff]  }
  0xb0   : > { %2929 = vmatprep.subr.bf16.mxu1 %v3237_v47  ;;  %v3940_v47 = vld [vmem:[%s3830_s7 + $0x44] sm:$0xf]  ;;  %v3951_v52 = vcombine.low %v391_v46, %v3935_v43 }
  0xb1   : > { %1364 = vmatmul.mubr.bf16.vlgmr.msra.gmra.mrb[0].mxu0 %v2408_v36  ;;  %v3258_v36 = vld [vmem:[#allocation4 + $0x118] sm:$0xff]   ;;  %v3943_v48 = vsel %vm488_vm0, %v519_v31, %v523_v32  ;;  %v398_v31 = vld [vmem:[%s3830_s7 + $0x54] sm:$0xf]  ;;  %v399_v32 = vld [vmem:[%s3830_s7 + $0x58] sm:$0xf] }
  0xb2   : > { %1493 = vmatmul.mubr.bf16.vlgmr.msra.gmra.mrb[0].mxu1 %v607_v56  ;;  %2842 = vmatpush3.bf16.msra.mxu0 %v3238_v53  ;;  %v3954_v53 = vld [vmem:[%s3830_s7 + $0x40] sm:$0xf]  ;;  %v618_v20 = vrot.slane %v3951_v52, 1 }
  0xb3   : > { %2930 = vmatpush3.bf16.msra.mxu1 %v3239_v54  ;;  %1500 = vmatprep.mubr.bf16.mxu1 %v3893_v61  ;;  %v3956_v54 = vrot.slane %v678_v38, 1  ;;  %v3966_v59 = vcombine.low %v3954_v53, %v3940_v47  ;;  %v3279_v38 = vld [vmem:[#allocation4 + $0x1f0] sm:$0xff]  }
  0xb4   : > { %2931 = vmatprep.subr.bf16.mxu1 %v3243_v4  ;;  %1371 = vmatprep.mubr.bf16.mxu0 %v508_v5  ;;  %v545_v4 = vshll.u32 %v3951_v52, 16  ;;  %v3270_v5 = vld [vmem:[#allocation4 + $0x168] sm:$0xff]  }
  0xb5   : > { %2843 = vmatprep.subr.bf16.mxu0 %v3242_v63  ;;  %v531_v63 = vrot.slane %v529_v49, 1  ;;  %v553_v7 = vshll.u32 %v3966_v59, 16 }
  0xb6   : > { %2844 = vmatpush3.bf16.msra.mxu0 %v3244_v6  ;;  %v3973_v6 = vld [vmem:[%s3830_s7 + $0x4c] sm:$0xf]  ;;  %v547_v19 = vrot.slane %v545_v4, 1  ;;  %v403_v4 = vld [vmem:[%s3830_s7 + $0x60] sm:$0xf] }
  0xb7   : > { %2932 = vmatpush3.bf16.msra.mxu1 %v3245_v8  ;;  %2845 = vmatprep.subr.bf16.mxu0 %v3250_v16  ;;  %v3271_v8 = vld [vmem:[#allocation4 + $0x1e8] sm:$0xff]   ;;  %v3977_v9 = vsel %vm488_vm0, %v527_v57, %v531_v63  ;;  %v395_v16 = vld [vmem:[%s3830_s7 + $0x48] sm:$0xf] }
  0xb8   : > { %2933 = vmatprep.subr.bf16.mxu1 %v3251_v21  ;;  %v549_v21 = vshrl.u32 %v3951_v52, 16 }
  0xb9   : > { %1372 = vmatmul.mubr.bf16.gmra.mrb[4].mxu0 %v3874_v39  ;;  %v3931_v39 = vrot.slane %v3907_v14, 1 }
  0xba   : > { %1501 = vmatmul.mubr.bf16.gmra.mrb[4].mxu1 %v609_v12  ;;  %1379 = vmatprep.mubr.bf16.mxu0 %v516_v22  ;;  %v539_v12 = vrot.slane %v537_v1, 1  ;;  %v3988_v22 = vcombine.low %v395_v16, %v3973_v6  ;;  %v551_v49 = vor.u32 %v549_v21, %v547_v19 }
  0xbb   : > { %1508 = vmatprep.mubr.bf16.mxu1 %v3910_v15  ;;  %2846 = vmatpush3.bf16.msra.mxu0 %v3252_v24  ;;  %v613_v56 = vsel %vm604_vm1, %v610_v18, %v3931_v39  ;;  %v791_v18 = vrot.slane %v3893_v61, 1  ;;  %v555_v24 = vrot.slane %v553_v7, 1  ;;  %v4044_v7 = vcombine.low %v3940_v47, %v395_v16  ;;  %v404_v16 = vld [vmem:[%s3830_s7 + $0x64] sm:$0xf] }
  0xbc   : > { %2934 = vmatpush3.bf16.msra.mxu1 %v3253_v26  ;;  %2847 = vmatprep.subr.bf16.mxu0 %v3256_v27  ;;  %v3996_v26 = vsel %vm604_vm1, %v3931_v39, %v614_v0  ;;  %v543_v41 = vor.u32 %v541_v13, %v539_v12 }
  0xbd   : > { %2935 = vmatprep.subr.bf16.mxu1 %v3257_v34  ;;  %4720 = vst [vmem:[#allocation23_spill] sm:$0xff] %v3996_v26  ;;  %v557_v34 = vshrl.u32 %v3966_v59, 16 }
  0xbe   : > { %v4032_v40 = vsel %vm488_vm0, %v543_v41, %v547_v19  ;;  %v4058_v19 = vld [vmem:[#allocation4 + $0x200] sm:$0xff]   ;;  %v4077_v41 = vcombine.low %v3991_v23, %v403_v4 }
  0xbf   : > { %2848 = vmatpush3.bf16.msra.mxu0 %v3258_v36  ;;  %v4005_v36 = vcombine.low %v399_v32, %v3991_v23 }
  0xc0   : > { %2936 = vmatpush3.bf16.msra.mxu1 %v3259_v42  ;;  %2849 = vmatprep.subr.bf16.mxu0 %v3264_v51  ;;  %v561_v42 = vshll.u32 %v3988_v22, 16  ;;  %v3281_v51 = vld [vmem:[#allocation4 + $0x1b0] sm:$0xff]  }
  0xc1   : > { %1380 = vmatmul.mubr.bf16.gmra.mrb[8].mxu0 %v3881_v44  ;;  %v533_v44 = vshrl.u32 %v3920_v28, 16  ;;  %2937 = vmatprep.subr.bf16.mxu1 %v3265_v55  ;;  %v3283_v55 = vld [vmem:[#allocation4 + $0x178] sm:$0xff]   ;;  %v581_v47 = vshrl.u32 %v4005_v36, 16 }
  0xc2   : > { %1509 = vmatmul.mubr.bf16.gmra.mrb[8].mxu1 %v611_v30  ;;  %1387 = vmatprep.mubr.bf16.mxu0 %v3943_v48  ;;  %v3999_v30 = vcombine.low %v3923_v29, %v391_v46  ;;  %v4701_v29 = vrot.slane %v3966_v59, 1  ;;  %v397_v46 = vld [vmem:[%s3830_s7 + $0x50] sm:$0xf] }
  0xc3   : > { %1516 = vmatprep.mubr.bf16.mxu1 %v3926_v33  ;;  %2850 = vmatpush3.bf16.msra.mxu0 %v3266_v62  ;;  %v535_v27 = vor.u32 %v533_v44, %v531_v63  ;;  %v681_v62 = vor.u32 %v3956_v54, %v676_v35  ;;  %v4020_v63 = vsel %vm604_vm1, %v614_v0, %v616_v10 }
  0xc4   : > { %2938 = vmatpush3.bf16.msra.mxu1 %v3267_v2  ;;  %2851 = vmatprep.subr.bf16.mxu0 %v3270_v5  ;;  %4721 = vst [vmem:[#allocation24_spill] sm:$0xff] %v4020_v63  ;;  %v4024_v44 = vcombine.low %v3935_v43, %v3954_v53  ;;  %v4026_v1 = vcombine.low %v397_v46, %v398_v31  ;;  %v577_v2 = vshll.u32 %v4005_v36, 16  ;;  %v3284_v5 = vld [vmem:[#allocation4 + $0x1f8] sm:$0xff]   ;;  %v4037_v43 = vrot.slane %v561_v42, 1  ;;  %v408_v42 = vld [vmem:[%s3830_s7 + $0x6c] sm:$0xf] }
  0xc5   : > { %2939 = vmatprep.subr.bf16.mxu1 %v3271_v8  ;;  %v4013_v57 = vsel %vm488_vm0, %v535_v27, %v539_v12  ;;  %v4035_v35 = vsel %vm604_vm1, %v616_v10, %v618_v20  ;;  %v559_v54 = vor.u32 %v557_v34, %v555_v24  ;;  %v3285_v53 = vld [vmem:[#allocation4 + $0x138] sm:$0xff]   ;;  %v4041_v0 = vsel %vm488_vm0, %v551_v49, %v555_v24  ;;  %v405_v24 = vld [vmem:[%s3830_s7 + $0x68] sm:$0xf] }
  0xc6   : > { %4722 = vst [vmem:[#allocation25_spill] sm:$0xff] %v4035_v35  ;;  %v4049_v8 = vsel %vm604_vm1, %v618_v20, %v4701_v29  ;;  %v3286_v10 = vld [vmem:[#allocation4 + $0x1b8] sm:$0xff]   ;;  %v4052_v12 = vcombine.low %v3973_v6, %v397_v46  ;;  %v4061_v21 = vrot.slane %v577_v2, 1  ;;  %v407_v6 = vld [vmem:[%s3830_s7 + $0xc] sm:$0xe]  ;;  %v793_v49 = vrot.slane %v3910_v15, 1 }
  0xc7   : > { %2852 = vmatpush3.bf16.msra.mxu0 %v3272_v11  ;;  %4723 = vst [vmem:[#allocation26_spill] sm:$0xff] %v4049_v8  ;;  %v4072_v34 = vsel %vm488_vm0, %v559_v54, %v4037_v43  ;;  %v687_v46 = vshrl.u32 %v3893_v61, 16  ;;  %v699_v54 = vshll.u32 %v3926_v33, 16 }
  0xc8   : > { %2940 = vmatpush3.bf16.msra.mxu1 %v3273_v17  ;;  %2853 = vmatprep.subr.bf16.mxu0 %v3278_v25  ;;  %v4064_v25 = vcombine.low %v403_v4, %v404_v16  ;;  %v4089_v23 = vor.u32 %v581_v47, %v4061_v21  ;;  %v4101_v4 = vcombine.low %v405_v24, %v408_v42  ;;  %v703_v47 = vshrl.u32 %v3926_v33, 16 }
  0xc9   : > { %1388 = vmatmul.mubr.bf16.gmra.mrb[12].mxu0 %v3898_v3  ;;  %2941 = vmatprep.subr.bf16.mxu1 %v3279_v38  ;;  %v4074_v38 = vcombine.low %v398_v31, %v399_v32  ;;  %v4091_v31 = vcombine.low %v404_v16, %v405_v24  ;;  %v795_v32 = vrot.slane %v3926_v33, 1  ;;  %v701_v16 = vrot.slane %v699_v54, 1 }
  0xca   : > { %1517 = vmatmul.mubr.bf16.gmra.mrb[12].mxu1 %v613_v56  ;;  %1395 = vmatprep.mubr.bf16.mxu0 %v3977_v9  ;;  %v683_v56 = vshll.u32 %v3893_v61, 16  ;;  %v799_v42 = vrot.slane %v3999_v30, 1  ;;  %v715_v61 = vshll.u32 %v3999_v30, 16  ;;  %v727_v54 = vshrl.u32 %v4024_v44, 16 }
  0xcb   : > { %1524 = vmatprep.mubr.bf16.mxu1 %v3962_v58  ;;  %2854 = vmatpush3.bf16.msra.mxu0 %v3280_v45  ;;  %v2435_v45 = vcombine.low %v407_v6, %v3871_v37  ;;  %v4098_v37 = vsel %vm604_vm1, %v791_v18, %v793_v49  ;;  %v707_v6 = vshll.u32 %v3962_v58, 16  ;;  %v705_v33 = vor.u32 %v703_v47, %v701_v16 }
  0xcc   : > { %2942 = vmatpush3.bf16.msra.mxu1 %v3281_v51  ;;  %2855 = vmatprep.subr.bf16.mxu0 %v3283_v55  ;;  %v685_v11 = vrot.slane %v683_v56, 1  ;;  %v691_v51 = vshll.u32 %v3910_v15, 16  ;;  %v695_v55 = vshrl.u32 %v3910_v15, 16 }
  0xcd   : > { %2943 = vmatprep.subr.bf16.mxu1 %v3284_v5  ;;  %v790_v56 = vrot.slane %v2435_v45, 1  ;;  %v4104_v5 = vsel %vm604_vm1, %v793_v49, %v795_v32  ;;  %v711_v45 = vshrl.u32 %v3962_v58, 16  ;;  %v719_v49 = vshrl.u32 %v3999_v30, 16 }
  0xce   : > { %v4068_v27 = vsel %vm488_vm0, %v681_v62, %v685_v11  ;;  %v689_v62 = vor.u32 %v687_v46, %v685_v11  ;;  %v693_v2 = vrot.slane %v691_v51, 1  ;;  %v709_v51 = vrot.slane %v707_v6, 1 }
  0xcf   : > { %2856 = vmatpush3.bf16.msra.mxu0 %v3285_v53  ;;  %v797_v53 = vrot.slane %v3962_v58, 1  ;;  %v4112_v15 = vsel %vm604_vm1, %v790_v56, %v791_v18  ;;  %v801_v18 = vrot.slane %v4024_v44, 1  ;;  %v723_v58 = vshll.u32 %v4024_v44, 16 }
  0xd0   : > { %2944 = vmatpush3.bf16.msra.mxu1 %v3286_v10  ;;  %3037 = vmatprep.subr.bf16.mxu0 %v4058_v19  ;;  %v4115_v10 = vsel %vm488_vm0, %v689_v62, %v693_v2  ;;  %v697_v11 = vor.u32 %v695_v55, %v693_v2  ;;  %v717_v55 = vrot.slane %v715_v61, 1  ;;  %v803_v62 = vrot.slane %v4044_v7, 1 }
  0xd1   : > { %1396 = vmatmul.mubr.bf16.gmra.mrb[16].mxu0 %v3907_v14  ;;  %3077 = vmatprep.subr.bf16.mxu1 %v4058_v19  ;;  %v4119_v24 = vsel %vm604_vm1, %v795_v32, %v797_v53  ;;  %v4131_v32 = vsel %vm604_vm1, %v797_v53, %v799_v42  ;;  %v4135_v56 = vsel %vm604_vm1, %v799_v42, %v801_v18  ;;  %v731_v53 = vshll.u32 %v4044_v7, 16 }
  0xd2   : > { %1525 = vmatmul.mubr.bf16.gmra.mrb[16].mxu1 %v3996_v26  ;;  %1403 = vmatprep.mubr.bf16.mxu0 %v4013_v57  ;;  %v4128_v46 = vsel %vm488_vm0, %v697_v11, %v701_v16  ;;  %v713_v2 = vor.u32 %v711_v45, %v709_v51  ;;  %v721_v11 = vor.u32 %v719_v49, %v717_v55  ;;  %v725_v47 = vrot.slane %v723_v58, 1 }
  0xd3   : > { %1532 = vmatprep.mubr.bf16.mxu1 %v3999_v30  ;;  %v4141_v30 = vsel %vm488_vm0, %v705_v33, %v709_v51  ;;  %v4146_v16 = vsel %vm604_vm1, %v801_v18, %v803_v62  ;;  %v805_v6 = vrot.slane %v4052_v12, 1  ;;  %v733_v61 = vrot.slane %v731_v53, 1 }
  0xd4   : > { %v4151_v42 = vsel %vm488_vm0, %v713_v2, %v717_v55  ;;  %v735_v33 = vshrl.u32 %v4044_v7, 16  ;;  %v739_v45 = vshll.u32 %v4052_v12, 16  ;;  %v729_v49 = vor.u32 %v727_v54, %v725_v47 }
  0xd5   : > { %v4160_v18 = vsel %vm604_vm1, %v803_v62, %v805_v6  ;;  %v807_v51 = vrot.slane %v4074_v38, 1  ;;  %v843_v55 = vshll.u32 %v4064_v25, 16  ;;  %v743_v2 = vshrl.u32 %v4052_v12, 16 }
  0xd6   : > { %v737_v58 = vor.u32 %v735_v33, %v733_v61  ;;  %v741_v20 = vrot.slane %v739_v45, 1  ;;  %v809_v54 = vrot.slane %v4077_v41, 1  ;;  %v847_v45 = vshrl.u32 %v4064_v25, 16 }
  0xd7   : > { %v4169_v53 = vsel %vm604_vm1, %v805_v6, %v807_v51  ;;  %v851_v6 = vshll.u32 %v4101_v4, 16 }
  0xd8   : > { %v4174_v62 = vsel %vm488_vm0, %v737_v58, %v741_v20  ;;  %v745_v33 = vor.u32 %v743_v2, %v741_v20  ;;  %v4702_v2 = vrot.slane %v4091_v31, 1 }
  0xd9   : > { %1404 = vmatmul.mubr.bf16.gmra.mrb[20].mxu0 %v3920_v28 }
  0xda   : > { %1533 = vmatmul.mubr.bf16.gmra.mrb[20].mxu1 %v4020_v63  ;;  %1411 = vmatprep.mubr.bf16.mxu0 %v4032_v40 }
  0xdb   : > { %1540 = vmatprep.mubr.bf16.mxu1 %v4024_v44  ;;  %v4157_v44 = vsel %vm488_vm0, %v721_v11, %v725_v47  ;;  %v747_v11 = vshll.u32 %v4074_v38, 16  ;;  %v845_v47 = vrot.slane %v843_v55, 1  ;;  %v755_v55 = vshll.u32 %v4077_v41, 16 }
  0xdd   : > { %v749_v17 = vrot.slane %v747_v11, 1  ;;  %v4186_v58 = vsel %vm488_vm0, %v4089_v23, %v845_v47  ;;  %v849_v20 = vor.u32 %v847_v45, %v845_v47  ;;  %v757_v13 = vrot.slane %v755_v55, 1  ;;  %v412_v55 = vld [vmem:[%s3830_s7 + $0x18] sm:$0xe] }
  0xde   : > { %v759_v47 = vshrl.u32 %v4077_v41, 16  ;;  %v4724_v45 = vrot.slane %v3988_v22, 1 }
  0xdf   : > { %v4191_v11 = vsel %vm488_vm0, %v745_v33, %v749_v17  ;;  %v4725_v33 = vrot.slane %v3966_v59, 1 }
  0xe0   : > { %v761_v26 = vor.u32 %v759_v47, %v757_v13  ;;  %v4728_v47 = vrot.slane %v3988_v22, 1 }
  0xe1   : > { %1412 = vmatmul.mubr.bf16.gmra.mrb[24].mxu0 %v3948_v50 }
  0xe2   : > { %1541 = vmatmul.mubr.bf16.gmra.mrb[24].mxu1 %v4035_v35  ;;  %1419 = vmatprep.mubr.bf16.mxu0 %v4041_v0 }
  0xe3   : > { %1548 = vmatprep.mubr.bf16.mxu1 %v4044_v7  ;;  %v4166_v7 = vsel %vm488_vm0, %v729_v49, %v733_v61  ;;  %v4179_v61 = vsel %vm604_vm1, %v807_v51, %v809_v54  ;;  %v751_v49 = vshrl.u32 %v4074_v38, 16  ;;  %v4193_v51 = vrot.slane %v851_v6, 1 }
  0xe4   : > { %v4208_v6 = vsel %vm604_vm1, %v4725_v33, %v4724_v45 }
  0xe5   : > { %v753_v29 = vor.u32 %v751_v49, %v749_v17  ;;  %v4212_v17 = vsel %vm488_vm0, %v849_v20, %v4193_v51  ;;  %v763_v49 = vshll.u32 %v4091_v31, 16  ;;  %v2440_v20 = vcombine.low %v412_v55, %v3891_v60  ;;  %v3287_v55 = vld [vmem:[%s3830_s7 + $0x60] ss:$0 sps:$4 sm:$0x11]  }
  0xe7   : > { %v4222_v63 = vsel %vm488_vm0, %v753_v29, %v757_v13  ;;  %v4224_v45 = vrot.slane %v763_v49, 1  ;;  %v624_v29 = vrot.slane %v4026_v1, 1  ;;  %v878_v13 = vrot.slane %v2440_v20, 1 }
  0xe9   : > { %1420 = vmatmul.mubr.bf16.gmra.mrb[28].mxu0 %v3951_v52  ;;  %v4230_v33 = vsel %vm488_vm0, %v761_v26, %v4224_v45  ;;  %v4241_v60 = vsel %vm604_vm1, %v878_v13, %v3931_v39  ;;  %v626_v26 = vrot.slane %v4005_v36, 1  ;;  %v882_v39 = vrot.slane %v4101_v4, 1 }
  0xea   : > { %1549 = vmatmul.mubr.bf16.gmra.mrb[28].mxu1 %v4049_v8  ;;  %1427 = vmatprep.mubr.bf16.mxu0 %v4072_v34  ;;  %v4727_v8 = vshll.u32 %v4026_v1, 16  ;;  %v585_v13 = vshll.u32 %v3287_v55, 16 }
  0xeb   : > { %1556 = vmatprep.mubr.bf16.mxu1 %v4052_v12  ;;  %v4199_v12 = vsel %vm604_vm1, %v809_v54, %v4702_v2  ;;  %v4726_v54 = vshrl.u32 %v3988_v22, 16 }
  0xec   : > { %v571_v35 = vrot.slane %v4727_v8, 1  ;;  %v573_v8 = vshrl.u32 %v4026_v1, 16 }
  0xed   : > { %v567_v2 = vor.u32 %v4726_v54, %v4037_v43 }
  0xee   : > { %v575_v49 = vor.u32 %v573_v8, %v571_v35  ;;  %v587_v8 = vrot.slane %v585_v13, 1 }
  0xef   : > { %v4233_v43 = vsel %vm488_vm0, %v567_v2, %v571_v35  ;;  %v880_v2 = vrot.slane %v4064_v25, 1  ;;  %v4270_v35 = vsel %vm604_vm1, %v624_v29, %v626_v26 }
  0xf0   : > { %v4259_v20 = vsel %vm488_vm0, %v575_v49, %v4061_v21  ;;  %v588_v21 = vsel %vm488_vm0, %v4089_v23, %v587_v8  ;;  %v3294_v23 = vld [vmem:[#allocation4 + $0x210] sm:$0xff]  }
  0xf1   : > { %1428 = vmatmul.mubr.bf16.gmra.mrb[32].mxu0 %v3966_v59  ;;  %v4253_v54 = vsel %vm604_vm1, %v626_v26, %v880_v2 }
  0xf2   : > { %1557 = vmatmul.mubr.bf16.gmra.mrb[32].mxu1 %v4208_v6  ;;  %1435 = vmatprep.mubr.bf16.mxu0 %v4233_v43 }
  0xf3   : > { %1564 = vmatprep.mubr.bf16.mxu1 %v4074_v38  ;;  %v4249_v38 = vsel %vm604_vm1, %v4728_v47, %v624_v29  ;;  %v4265_v47 = vsel %vm604_vm1, %v880_v2, %v882_v39  ;;  %v3293_v29 = vld [vmem:[#allocation4 + $0x208] sm:$0xff]  }
  0xf9   : > { %1436 = vmatmul.mubr.bf16.gmra.mrb[36].mxu0 %v3988_v22 }
  0xfa   : > { %1565 = vmatmul.mubr.bf16.gmra.mrb[36].mxu1 %v4249_v38  ;;  %1443 = vmatprep.mubr.bf16.mxu0 %v4259_v20 }
  0xfb   : > { %1572 = vmatprep.mubr.bf16.mxu1 %v4077_v41  ;;  %v628_v41 = vrot.slane %v3287_v55, 1 }
  0xfd   : > { %v629_v2 = vsel %vm604_vm1, %v626_v26, %v628_v41 }
 0x101   : > { %1444 = vmatmul.mubr.bf16.gmra.mrb[40].mxu0 %v4026_v1 }
 0x102   : > { %1573 = vmatmul.mubr.bf16.gmra.mrb[40].mxu1 %v4270_v35  ;;  %1451 = vmatprep.mubr.bf16.mxu0 %v588_v21 }
 0x103   : > { %1580 = vmatprep.mubr.bf16.mxu1 %v4091_v31 }
 0x109   : > { %1452 = vmatmul.mubr.bf16.gmra.mrb[44].mxu0 %v4005_v36 }
 0x10a   : > { %1581 = vmatmul.mubr.bf16.gmra.mrb[44].mxu1 %v629_v2  ;;  %1621 = vmatprep.mubr.bf16.mxu0 %v4112_v15  ;;  %v767_v15 = vshrl.u32 %v4091_v31, 16 }
 0x10b   : > { %1750 = vmatprep.mubr.bf16.mxu1 %v3943_v48  ;;  %v3295_v48 = vld [vmem:[#allocation4 + $0x218] sm:$0xff]  }
 0x111   : > { %1622 = vmatmul.mubr.bf16.vlgmr.msra.gmra.mrb[48].mxu0 %v4068_v27  ;;  %v3301_v27 = vld [vmem:[%s3830_s7 + $0x6c] ss:$0 sps:$4 sm:$0x11]  }
 0x112   : > { %1751 = vmatmul.mubr.bf16.vlgmr.msra.gmra.mrb[48].mxu1 %v3898_v3  ;;  %3038 = vmatpush3.bf16.msra.mxu0 %v4058_v19  ;;  %v3296_v3 = vld [vmem:[#allocation4 + $0x220] sm:$0xff]  }
 0x113   : > { %3085 = vmatpush3.bf16.msra.mxu1 %v4058_v19  ;;  %1758 = vmatprep.mubr.bf16.mxu1 %v3977_v9  ;;  %v3297_v9 = vld [vmem:[#allocation4 + $0x228] sm:$0xff]  }
 0x114   : > { %3078 = vmatprep.subr.bf16.mxu1 %v3293_v29  ;;  %1629 = vmatprep.mubr.bf16.mxu0 %v4098_v37  ;;  %v813_v37 = vrot.slane %v3301_v27, 1 }
 0x115   : > { %3039 = vmatprep.subr.bf16.mxu0 %v3293_v29 }
 0x116   : > { %3040 = vmatpush3.bf16.msra.mxu0 %v3293_v29 }
 0x117   : > { %3086 = vmatpush3.bf16.msra.mxu1 %v3293_v29  ;;  %3041 = vmatprep.subr.bf16.mxu0 %v3294_v23 }
 0x118   : > { %3079 = vmatprep.subr.bf16.mxu1 %v3294_v23 }
 0x119   : > { %1630 = vmatmul.mubr.bf16.gmra.mrb[52].mxu0 %v4115_v10  ;;  %v771_v10 = vshll.u32 %v3301_v27, 16 }
 0x11a   : > { %1759 = vmatmul.mubr.bf16.gmra.mrb[52].mxu1 %v3907_v14  ;;  %1637 = vmatprep.mubr.bf16.mxu0 %v4104_v5  ;;  %v3298_v14 = vld [vmem:[#allocation4 + $0x230] sm:$0xff]  }
 0x11b   : > { %1766 = vmatprep.mubr.bf16.mxu1 %v4013_v57  ;;  %3087 = vmatpush3.bf16.msra.mxu1 %v3294_v23  ;;  %v3300_v57 = vld [vmem:[#allocation4 + $0x238] sm:$0xff]  }
 0x11c   : > { %3080 = vmatprep.subr.bf16.mxu1 %v3295_v48  ;;  %3042 = vmatpush3.bf16.msra.mxu0 %v3294_v23 }
 0x11d   : > { %3043 = vmatprep.subr.bf16.mxu0 %v3295_v48 }
 0x11f   : > { %3088 = vmatpush3.bf16.msra.mxu1 %v3295_v48 }
 0x120   : > { %3081 = vmatprep.subr.bf16.mxu1 %v3296_v3  ;;  %3044 = vmatpush3.bf16.msra.mxu0 %v3295_v48 }
 0x121   : > { %3045 = vmatprep.subr.bf16.mxu0 %v3296_v3  ;;  %1638 = vmatmul.mubr.bf16.gmra.mrb[56].mxu0 %v4128_v46  ;;  %v773_v46 = vrot.slane %v771_v10, 1 }
 0x122   : > { %1767 = vmatmul.mubr.bf16.gmra.mrb[56].mxu1 %v3920_v28  ;;  %1645 = vmatprep.mubr.bf16.mxu0 %v4119_v24  ;;  %v3299_v28 = vld [vmem:[%s3830_s7 + $0x70] sm:$0xff]   ;;  %v4729_v24 = vrot.slane %v4091_v31, 1 }
 0x123   : > { %1774 = vmatprep.mubr.bf16.mxu1 %v4032_v40  ;;  %3089 = vmatpush3.bf16.msra.mxu1 %v3296_v3  ;;  %v3302_v40 = vld [vmem:[%s3830_s7 + $0x78] ss:$0 sps:$4 sm:$0x11]   ;;  %v884_v31 = vrot.slane %v3299_v28, 1  ;;  %s2277_s7 = sadd.s32 %s3095_s18, %s3094_s28 }
 0x124   : > { %3082 = vmatprep.subr.bf16.mxu1 %v3297_v9  ;;  %3046 = vmatpush3.bf16.msra.mxu0 %v3296_v3  ;;  %v867_v19 = vshll.u32 %v3302_v40, 16  ;;  %s2562_s15 = sshll.u32 %s2277_s7, 6 }
 0x125   : > { %3047 = vmatprep.subr.bf16.mxu0 %v3297_v9  ;;  %s4627_s29 = scalar_lea.hbm %s4690_s3, %s2562_s15 }
 0x127   : > { %3090 = vmatpush3.bf16.msra.mxu1 %v3297_v9 }
 0x128   : > { %3083 = vmatprep.subr.bf16.mxu1 %v3298_v14  ;;  %3048 = vmatpush3.bf16.msra.mxu0 %v3297_v9 }
 0x129   : > { %3049 = vmatprep.subr.bf16.mxu0 %v3298_v14  ;;  %1646 = vmatmul.mubr.bf16.gmra.mrb[60].mxu0 %v4141_v30  ;;  %v4731_v30 = vld [vmem:[#allocation24_spill] sm:$0xff] }
 0x12a   : > { %1775 = vmatmul.mubr.bf16.gmra.mrb[60].mxu1 %v3948_v50  ;;  %1653 = vmatprep.mubr.bf16.mxu0 %v4131_v32  ;;  %v855_v50 = vshrl.u32 %v4101_v4, 16 }
 0x12b   : > { %1782 = vmatprep.mubr.bf16.mxu1 %v4041_v0  ;;  %3091 = vmatpush3.bf16.msra.mxu1 %v3298_v14  ;;  %v863_v0 = vshrl.u32 %v3299_v28, 16 }
 0x12c   : > { %3084 = vmatprep.subr.bf16.mxu1 %v3300_v57  ;;  %3050 = vmatpush3.bf16.msra.mxu0 %v3298_v14 }
 0x12d   : > { %3051 = vmatprep.subr.bf16.mxu0 %v3300_v57 }
 0x12f   : > { %3092 = vmatpush3.bf16.msra.mxu1 %v3300_v57 }
 0x130   : > { %3052 = vmatpush3.bf16.msra.mxu0 %v3300_v57 }
 0x131   : > { %1654 = vmatmul.mubr.bf16.gmra.mrb[64].mxu0 %v4151_v42  ;;  %v886_v42 = vrot.slane %v3302_v40, 1 }
 0x132   : > { %1783 = vmatmul.mubr.bf16.gmra.mrb[64].mxu1 %v3951_v52  ;;  %1661 = vmatprep.mubr.bf16.mxu0 %v4135_v56  ;;  %v859_v52 = vshll.u32 %v3299_v28, 16  ;;  %v4730_v56 = vld [vmem:[#allocation23_spill] sm:$0xff] }
 0x133   : > { %1790 = vmatprep.mubr.bf16.mxu1 %v4072_v34 }
 0x139   : > { %1662 = vmatmul.mubr.bf16.gmra.mrb[68].mxu0 %v4157_v44  ;;  %v4732_v44 = vld [vmem:[#allocation25_spill] sm:$0xff] }
 0x13a   : > { %1791 = vmatmul.mubr.bf16.gmra.mrb[68].mxu1 %v3966_v59  ;;  %1669 = vmatprep.mubr.bf16.mxu0 %v4146_v16  ;;  %v857_v59 = vor.u32 %v855_v50, %v4193_v51  ;;  %v885_v16 = vsel %vm604_vm1, %v882_v39, %v884_v31  ;;  %v4351_v51 = vld [vmem:[#allocation7] ss:$0 sm:$0xff] }
 0x13b   : > { %1798 = vmatprep.mubr.bf16.mxu1 %v4233_v43 }
 0x141   : > { %1670 = vmatmul.mubr.bf16.gmra.mrb[72].mxu0 %v4166_v7  ;;  %v887_v7 = vsel %vm604_vm1, %v884_v31, %v886_v42 }
 0x142   : > { %1799 = vmatmul.mubr.bf16.gmra.mrb[72].mxu1 %v3988_v22  ;;  %1677 = vmatprep.mubr.bf16.mxu0 %v4160_v18  ;;  %v861_v22 = vrot.slane %v859_v52, 1  ;;  %v4733_v18 = vld [vmem:[#allocation26_spill] sm:$0xff] }
 0x143   : > { %1806 = vmatprep.mubr.bf16.mxu1 %v4259_v20 }
 0x144   : > { %v865_v34 = vor.u32 %v863_v0, %v861_v22 }
 0x149   : > { %1678 = vmatmul.mubr.bf16.gmra.mrb[76].mxu0 %v4174_v62 }
 0x14a   : > { %1807 = vmatmul.mubr.bf16.gmra.mrb[76].mxu1 %v4026_v1  ;;  %1685 = vmatprep.mubr.bf16.mxu0 %v4169_v53  ;;  %v862_v1 = vsel %vm488_vm0, %v857_v59, %v861_v22 }
 0x14b   : > { %1814 = vmatprep.mubr.bf16.mxu1 %v4186_v58 }
 0x151   : > { %1686 = vmatmul.mubr.bf16.gmra.mrb[80].mxu0 %v4191_v11 }
 0x152   : > { %1815 = vmatmul.mubr.bf16.gmra.mrb[80].mxu1 %v4005_v36  ;;  %1693 = vmatprep.mubr.bf16.mxu0 %v4179_v61  ;;  %v869_v36 = vrot.slane %v867_v19, 1 }
 0x153   : > { %1822 = vmatprep.mubr.bf16.mxu1 %v4212_v17 }
 0x154   : > { %v870_v5 = vsel %vm488_vm0, %v865_v34, %v869_v36 }
 0x159   : > { %1694 = vmatmul.mubr.bf16.gmra.mrb[84].mxu0 %v4222_v63  ;;  %v769_v63 = vor.u32 %v767_v15, %v4224_v45 }
 0x15a   : > { %1823 = vmatmul.mubr.bf16.gmra.mrb[84].mxu1 %v4064_v25  ;;  %1701 = vmatprep.mubr.bf16.mxu0 %v4199_v12  ;;  %v814_v25 = vsel %vm604_vm1, %v4729_v24, %v813_v37 }
 0x15b   : > { %1830 = vmatprep.mubr.bf16.mxu1 %v862_v1  ;;  %v774_v32 = vsel %vm488_vm0, %v769_v63, %v773_v46 }
 0x161   : > { %1702 = vmatmul.mubr.bf16.gmra.mrb[88].mxu0 %v4230_v33 }
 0x162   : > { %1831 = vmatmul.mubr.bf16.gmra.mrb[88].mxu1 %v4101_v4  ;;  %1709 = vmatprep.mubr.bf16.mxu0 %v814_v25 }
 0x163   : > { %1838 = vmatprep.mubr.bf16.mxu1 %v870_v5 }
 0x169   : > { %1710 = vmatmul.mubr.bf16.gmra.mrb[92].mxu0 %v774_v32 }
 0x16a   : > { %1839 = vmatmul.mubr.bf16.gmra.mrb[92].mxu1 %v3299_v28  ;;  %3053 = vmatprep.mubr.bf16.mxu0 %v4241_v60 }
 0x16b   : > { %3065 = vmatprep.mubr.bf16.mxu1 %v4249_v38 }
 0x171   : > { %3054 = vmatmul.mubr.bf16.vlgmr.msra.gmra.mrb[96].mxu0 %v4730_v56 }
 0x172   : > { %3066 = vmatmul.mubr.bf16.vlgmr.msra.gmra.mrb[96].mxu1 %v4270_v35  ;;  %3057 = vmatprep.mubr.bf16.mxu0 %v4731_v30 }
 0x173   : > { %3069 = vmatprep.mubr.bf16.mxu1 %v4253_v54 }
 0x179   : > { %3058 = vmatmul.mubr.bf16.gmra.mrb[100].mxu0 %v4732_v44 }
 0x17a   : > { %3070 = vmatmul.mubr.bf16.gmra.mrb[100].mxu1 %v4265_v47  ;;  %3061 = vmatprep.mubr.bf16.mxu0 %v4733_v18 }
 0x17b   : > { %3073 = vmatprep.mubr.bf16.mxu1 %v885_v16 }
 0x181   : > { %3062 = vmatmul.mubr.bf16.gmra.mrb[104].mxu0 %v4208_v6 }
 0x182   : > { %3074 = vmatmul.mubr.bf16.gmra.mrb[104].mxu1 %v887_v7 }
 0x184   : > { %v2681_v4 = vpop.f32.mrb[0].mxu0 }
 0x185   : > { %v2769_v53 = vpop.f32.mrb[0].mxu1  ;;  %v2682_v12 = vpop.f32.mrb[1].mxu0 }
 0x186   : > { %v2770_v62 = vpop.f32.mrb[1].mxu1  ;;  %v2683_v45 = vadd.f32 %v2682_v12, %v2681_v4  ;;  %v2684_v33 = vpop.f32.mrb[2].mxu0 }
 0x187   : > { %v2771_v61 = vadd.f32 %v2770_v62, %v2769_v53  ;;  %v2772_v58 = vpop.f32.mrb[2].mxu1  ;;  %v2685_v43 = vpop.f32.mrb[3].mxu0 }
 0x188   : > { %v2773_v11 = vpop.f32.mrb[3].mxu1  ;;  %v1366_v60 = vadd.f32 %v2683_v45, %v4351_v51  ;;  %v2686_v26 = vadd.f32 %v2685_v43, %v2684_v33 }
 0x189   : > { %v2774_v17 = vadd.f32 %v2773_v11, %v2772_v58 }
 0x18a   : > { %v4354_v49 = vadd.f32 %v2771_v61, %v1366_v60  ;;  %v1369_v6 = vadd.f32 %v2686_v26, %v4351_v51 }
 0x18c   : > { %v4357_v20 = vadd.f32 %v2774_v17, %v1369_v6  ;;  %v2687_v13 = vpop.f32.mrb[4].mxu0 }
 0x18d   : > { %v2775_v38 = vpop.f32.mrb[4].mxu1  ;;  %v2688_v35 = vpop.f32.mrb[5].mxu0 }
 0x18e   : > { %v2776_v55 = vpop.f32.mrb[5].mxu1  ;;  %v2689_v21 = vadd.f32 %v2688_v35, %v2687_v13  ;;  %v2690_v41 = vpop.f32.mrb[6].mxu0 }
 0x18f   : > { %v2777_v54 = vadd.f32 %v2776_v55, %v2775_v38  ;;  %v2778_v39 = vpop.f32.mrb[6].mxu1  ;;  %v2691_v2 = vpop.f32.mrb[7].mxu0 }
 0x190   : > { %v2779_v47 = vpop.f32.mrb[7].mxu1  ;;  %v1374_v29 = vadd.f32 %v2689_v21, %v4351_v51  ;;  %v2692_v23 = vadd.f32 %v2691_v2, %v2690_v41 }
 0x191   : > { %v2780_v8 = vadd.f32 %v2779_v47, %v2778_v39 }
 0x192   : > { %v4360_v3 = vadd.f32 %v2777_v54, %v1374_v29  ;;  %v1377_v9 = vadd.f32 %v2692_v23, %v4351_v51 }
 0x194   : > { %v4363_v50 = vadd.f32 %v2780_v8, %v1377_v9  ;;  %v2693_v52 = vpop.f32.mrb[8].mxu0 }
 0x195   : > { %v2781_v48 = vpop.f32.mrb[8].mxu1  ;;  %v2694_v22 = vpop.f32.mrb[9].mxu0 }
 0x196   : > { %v2782_v14 = vpop.f32.mrb[9].mxu1  ;;  %v2695_v1 = vadd.f32 %v2694_v22, %v2693_v52  ;;  %v2696_v0 = vpop.f32.mrb[10].mxu0 }
 0x197   : > { %v2783_v57 = vadd.f32 %v2782_v14, %v2781_v48  ;;  %v2784_v28 = vpop.f32.mrb[10].mxu1  ;;  %v2697_v19 = vpop.f32.mrb[11].mxu0 }
 0x198   : > { %v2785_v59 = vpop.f32.mrb[11].mxu1  ;;  %v1382_v27 = vadd.f32 %v2695_v1, %v4351_v51  ;;  %v2698_v34 = vadd.f32 %v2697_v19, %v2696_v0 }
 0x199   : > { %v2786_v40 = vadd.f32 %v2785_v59, %v2784_v28 }
 0x19a   : > { %v4366_v37 = vadd.f32 %v2783_v57, %v1382_v27  ;;  %v1385_v5 = vadd.f32 %v2698_v34, %v4351_v51 }
 0x19c   : > { %v4369_v25 = vadd.f32 %v2786_v40, %v1385_v5  ;;  %v2699_v63 = vpop.f32.mrb[12].mxu0 }
 0x19d   : > { %v2787_v36 = vpop.f32.mrb[12].mxu1  ;;  %v2700_v32 = vpop.f32.mrb[13].mxu0 }
 0x19e   : > { %v2788_v15 = vpop.f32.mrb[13].mxu1  ;;  %v2701_v56 = vadd.f32 %v2700_v32, %v2699_v63  ;;  %v2702_v30 = vpop.f32.mrb[14].mxu0 }
 0x19f   : > { %v2789_v10 = vadd.f32 %v2788_v15, %v2787_v36  ;;  %v2790_v24 = vpop.f32.mrb[14].mxu1  ;;  %v2703_v16 = vpop.f32.mrb[15].mxu0 }
 0x1a0   : > { %v2791_v46 = vpop.f32.mrb[15].mxu1  ;;  %v1390_v42 = vadd.f32 %v2701_v56, %v4351_v51  ;;  %v2704_v44 = vadd.f32 %v2703_v16, %v2702_v30 }
 0x1a1   : > { %v2792_v31 = vadd.f32 %v2791_v46, %v2790_v24 }
 0x1a2   : > { %v4372_v7 = vadd.f32 %v2789_v10, %v1390_v42  ;;  %v1393_v53 = vadd.f32 %v2704_v44, %v4351_v51 }
 0x1a4   : > { %v4375_v4 = vadd.f32 %v2792_v31, %v1393_v53  ;;  %v2705_v11 = vpop.f32.mrb[16].mxu0 }
 0x1a5   : > { %v2793_v18 = vpop.f32.mrb[16].mxu1  ;;  %v2706_v17 = vpop.f32.mrb[17].mxu0 }
 0x1a6   : > { %v2794_v62 = vpop.f32.mrb[17].mxu1  ;;  %v2707_v33 = vadd.f32 %v2706_v17, %v2705_v11  ;;  %v2708_v43 = vpop.f32.mrb[18].mxu0 }
 0x1a7   : > { %v2795_v61 = vadd.f32 %v2794_v62, %v2793_v18  ;;  %v2796_v58 = vpop.f32.mrb[18].mxu1  ;;  %v2709_v60 = vpop.f32.mrb[19].mxu0 }
 0x1a8   : > { %v2797_v12 = vpop.f32.mrb[19].mxu1  ;;  %v1398_v26 = vadd.f32 %v2707_v33, %v4351_v51  ;;  %v2710_v38 = vadd.f32 %v2709_v60, %v2708_v43 }
 0x1a9   : > { %v2798_v45 = vadd.f32 %v2797_v12, %v2796_v58 }
 0x1aa   : > { %v4378_v55 = vadd.f32 %v2795_v61, %v1398_v26  ;;  %v1401_v54 = vadd.f32 %v2710_v38, %v4351_v51 }
 0x1ac   : > { %v4381_v35 = vadd.f32 %v2798_v45, %v1401_v54  ;;  %v2711_v8 = vpop.f32.mrb[20].mxu0 }
 0x1ad   : > { %v2799_v6 = vpop.f32.mrb[20].mxu1  ;;  %v2712_v41 = vpop.f32.mrb[21].mxu0 }
 0x1ae   : > { %v2800_v39 = vpop.f32.mrb[21].mxu1  ;;  %v2713_v29 = vadd.f32 %v2712_v41, %v2711_v8  ;;  %v2714_v23 = vpop.f32.mrb[22].mxu0 }
 0x1af   : > { %v2801_v13 = vadd.f32 %v2800_v39, %v2799_v6  ;;  %v2802_v47 = vpop.f32.mrb[22].mxu1  ;;  %v2715_v48 = vpop.f32.mrb[23].mxu0 }
 0x1b0   : > { %v2803_v21 = vpop.f32.mrb[23].mxu1  ;;  %v1406_v9 = vadd.f32 %v2713_v29, %v4351_v51  ;;  %v2716_v14 = vadd.f32 %v2715_v48, %v2714_v23 }
 0x1b1   : > { %v2804_v2 = vadd.f32 %v2803_v21, %v2802_v47 }
 0x1b2   : > { %v4384_v28 = vadd.f32 %v2801_v13, %v1406_v9  ;;  %v1409_v52 = vadd.f32 %v2716_v14, %v4351_v51 }
 0x1b4   : > { %v4387_v1 = vadd.f32 %v2804_v2, %v1409_v52  ;;  %v2717_v0 = vpop.f32.mrb[24].mxu0 }
 0x1b5   : > { %v2805_v57 = vpop.f32.mrb[24].mxu1  ;;  %v2718_v27 = vpop.f32.mrb[25].mxu0 }
 0x1b6   : > { %v2806_v59 = vpop.f32.mrb[25].mxu1  ;;  %v2719_v36 = vadd.f32 %v2718_v27, %v2717_v0  ;;  %v2720_v5 = vpop.f32.mrb[26].mxu0 }
 0x1b7   : > { %v2807_v22 = vadd.f32 %v2806_v59, %v2805_v57  ;;  %v2808_v40 = vpop.f32.mrb[26].mxu1  ;;  %v2721_v15 = vpop.f32.mrb[27].mxu0 }
 0x1b8   : > { %v2809_v19 = vpop.f32.mrb[27].mxu1  ;;  %v1414_v10 = vadd.f32 %v2719_v36, %v4351_v51  ;;  %v2722_v24 = vadd.f32 %v2721_v15, %v2720_v5 }
 0x1b9   : > { %v2810_v34 = vadd.f32 %v2809_v19, %v2808_v40 }
 0x1ba   : > { %v4390_v46 = vadd.f32 %v2807_v22, %v1414_v10  ;;  %v1417_v32 = vadd.f32 %v2722_v24, %v4351_v51 }
 0x1bc   : > { %v4393_v16 = vadd.f32 %v2810_v34, %v1417_v32  ;;  %v2723_v42 = vpop.f32.mrb[28].mxu0 }
 0x1bd   : > { %v2811_v63 = vpop.f32.mrb[28].mxu1  ;;  %v2724_v18 = vpop.f32.mrb[29].mxu0 }
 0x1be   : > { %v2812_v31 = vpop.f32.mrb[29].mxu1  ;;  %v2725_v62 = vadd.f32 %v2724_v18, %v2723_v42  ;;  %v2726_v61 = vpop.f32.mrb[30].mxu0 }
 0x1bf   : > { %v2813_v56 = vadd.f32 %v2812_v31, %v2811_v63  ;;  %v2814_v30 = vpop.f32.mrb[30].mxu1  ;;  %v2727_v58 = vpop.f32.mrb[31].mxu0 }
 0x1c0   : > { %v2815_v44 = vpop.f32.mrb[31].mxu1  ;;  %v1422_v11 = vadd.f32 %v2725_v62, %v4351_v51  ;;  %v2728_v12 = vadd.f32 %v2727_v58, %v2726_v61 }
 0x1c1   : > { %v2816_v53 = vadd.f32 %v2815_v44, %v2814_v30 }
 0x1c2   : > { %v4396_v45 = vadd.f32 %v2813_v56, %v1422_v11  ;;  %v1425_v33 = vadd.f32 %v2728_v12, %v4351_v51 }
 0x1c4   : > { %v4399_v38 = vadd.f32 %v2816_v53, %v1425_v33  ;;  %v2729_v6 = vpop.f32.mrb[32].mxu0 }
 0x1c5   : > { %v2817_v17 = vpop.f32.mrb[32].mxu1  ;;  %v2730_v39 = vpop.f32.mrb[33].mxu0 }
 0x1c6   : > { %v2818_v43 = vpop.f32.mrb[33].mxu1  ;;  %v2731_v47 = vadd.f32 %v2730_v39, %v2729_v6  ;;  %v2732_v8 = vpop.f32.mrb[34].mxu0 }
 0x1c7   : > { %v2819_v60 = vadd.f32 %v2818_v43, %v2817_v17  ;;  %v2820_v26 = vpop.f32.mrb[34].mxu1  ;;  %v2733_v21 = vpop.f32.mrb[35].mxu0 }
 0x1c8   : > { %v2821_v54 = vpop.f32.mrb[35].mxu1  ;;  %v1430_v41 = vadd.f32 %v2731_v47, %v4351_v51  ;;  %v2734_v2 = vadd.f32 %v2733_v21, %v2732_v8 }
 0x1c9   : > { %v2822_v13 = vadd.f32 %v2821_v54, %v2820_v26 }
 0x1ca   : > { %v4402_v23 = vadd.f32 %v2819_v60, %v1430_v41  ;;  %v1433_v48 = vadd.f32 %v2734_v2, %v4351_v51 }
 0x1cc   : > { %v4405_v52 = vadd.f32 %v2822_v13, %v1433_v48  ;;  %v2735_v59 = vpop.f32.mrb[36].mxu0 }
 0x1cd   : > { %v2823_v29 = vpop.f32.mrb[36].mxu1  ;;  %v2736_v40 = vpop.f32.mrb[37].mxu0 }
 0x1ce   : > { %v2824_v9 = vpop.f32.mrb[37].mxu1  ;;  %v2737_v19 = vadd.f32 %v2736_v40, %v2735_v59  ;;  %v2738_v27 = vpop.f32.mrb[38].mxu0 }
 0x1cf   : > { %v2825_v14 = vadd.f32 %v2824_v9, %v2823_v29  ;;  %v2826_v57 = vpop.f32.mrb[38].mxu1  ;;  %v2739_v34 = vpop.f32.mrb[39].mxu0 }
 0x1d0   : > { %v2827_v22 = vpop.f32.mrb[39].mxu1  ;;  %v1438_v36 = vadd.f32 %v2737_v19, %v4351_v51  ;;  %v2740_v5 = vadd.f32 %v2739_v34, %v2738_v27 }
 0x1d1   : > { %v2828_v0 = vadd.f32 %v2827_v22, %v2826_v57 }
 0x1d2   : > { %v4408_v10 = vadd.f32 %v2825_v14, %v1438_v36  ;;  %v1441_v24 = vadd.f32 %v2740_v5, %v4351_v51 }
 0x1d4   : > { %v4411_v56 = vadd.f32 %v2828_v0, %v1441_v24  ;;  %v2741_v30 = vpop.f32.mrb[40].mxu0 }
 0x1d5   : > { %v2829_v15 = vpop.f32.mrb[40].mxu1  ;;  %v2742_v44 = vpop.f32.mrb[41].mxu0 }
 0x1d6   : > { %v2830_v63 = vpop.f32.mrb[41].mxu1  ;;  %v2743_v53 = vadd.f32 %v2742_v44, %v2741_v30  ;;  %v2744_v62 = vpop.f32.mrb[42].mxu0 }
 0x1d7   : > { %v2831_v32 = vadd.f32 %v2830_v63, %v2829_v15  ;;  %v2832_v31 = vpop.f32.mrb[42].mxu1  ;;  %v2745_v61 = vpop.f32.mrb[43].mxu0 }
 0x1d8   : > { %v2833_v42 = vpop.f32.mrb[43].mxu1  ;;  %v1446_v58 = vadd.f32 %v2743_v53, %v4351_v51  ;;  %v2746_v11 = vadd.f32 %v2745_v61, %v2744_v62 }
 0x1d9   : > { %v2834_v18 = vadd.f32 %v2833_v42, %v2832_v31 }
 0x1da   : > { %v4414_v17 = vadd.f32 %v2831_v32, %v1446_v58  ;;  %v1449_v33 = vadd.f32 %v2746_v11, %v4351_v51 }
 0x1dc   : > { %v4417_v6 = vadd.f32 %v2834_v18, %v1449_v33  ;;  %v2747_v54 = vpop.f32.mrb[44].mxu0 }
 0x1dd   : > { %v2835_v12 = vpop.f32.mrb[44].mxu1  ;;  %v2748_v13 = vpop.f32.mrb[45].mxu0 }
 0x1de   : > { %v2836_v43 = vpop.f32.mrb[45].mxu1  ;;  %v2749_v8 = vadd.f32 %v2748_v13, %v2747_v54  ;;  %v2750_v21 = vpop.f32.mrb[46].mxu0 }
 0x1df   : > { %v2837_v60 = vadd.f32 %v2836_v43, %v2835_v12  ;;  %v2838_v26 = vpop.f32.mrb[46].mxu1  ;;  %v2751_v41 = vpop.f32.mrb[47].mxu0 }
 0x1e0   : > { %v2839_v39 = vpop.f32.mrb[47].mxu1  ;;  %v1454_v2 = vadd.f32 %v2749_v8, %v4351_v51  ;;  %v2752_v29 = vadd.f32 %v2751_v41, %v2750_v21 }
 0x1e1   : > { %v2840_v47 = vadd.f32 %v2839_v39, %v2838_v26 }
 0x1e2   : > { %v4420_v9 = vadd.f32 %v2837_v60, %v1454_v2  ;;  %v1457_v14 = vadd.f32 %v2752_v29, %v4351_v51 }
 0x1e4   : > { %v4423_v40 = vadd.f32 %v2840_v47, %v1457_v14  ;;  %v2857_v0 = vpop.f32.mrb[48].mxu0 }
 0x1e5   : > { %v2945_v48 = vpop.f32.mrb[48].mxu1  ;;  %v2858_v27 = vpop.f32.mrb[49].mxu0 }
 0x1e6   : > { %v2946_v57 = vpop.f32.mrb[49].mxu1  ;;  %v2859_v36 = vadd.f32 %v2858_v27, %v2857_v0  ;;  %v2860_v5 = vpop.f32.mrb[50].mxu0 }
 0x1e7   : > { %v2947_v59 = vadd.f32 %v2946_v57, %v2945_v48  ;;  %v2948_v22 = vpop.f32.mrb[50].mxu1  ;;  %v2861_v15 = vpop.f32.mrb[51].mxu0 }
 0x1e8   : > { %v2949_v19 = vpop.f32.mrb[51].mxu1  ;;  %v1624_v24 = vadd.f32 %v2859_v36, %v4354_v49  ;;  %v2862_v63 = vadd.f32 %v2861_v15, %v2860_v5 }
 0x1e9   : > { %v2950_v34 = vadd.f32 %v2949_v19, %v2948_v22 }
 0x1ea   : > { %v1627_v31 = vadd.f32 %v2862_v63, %v4357_v20  ;;  %v4427_v51 = vadd.f32 %v2947_v59, %v1624_v24 }
 0x1ec   : > { %v2863_v18 = vpop.f32.mrb[52].mxu0  ;;  %v4429_v62 = vadd.f32 %v2950_v34, %v1627_v31 }
 0x1ed   : > { %v2951_v32 = vpop.f32.mrb[52].mxu1  ;;  %v2864_v61 = vpop.f32.mrb[53].mxu0 }
 0x1ee   : > { %v2952_v30 = vpop.f32.mrb[53].mxu1  ;;  %v2865_v11 = vadd.f32 %v2864_v61, %v2863_v18  ;;  %v2866_v12 = vpop.f32.mrb[54].mxu0 }
 0x1ef   : > { %v2953_v42 = vadd.f32 %v2952_v30, %v2951_v32  ;;  %v2954_v44 = vpop.f32.mrb[54].mxu1  ;;  %v2867_v33 = vpop.f32.mrb[55].mxu0 }
 0x1f0   : > { %v2955_v53 = vpop.f32.mrb[55].mxu1  ;;  %v1632_v49 = vadd.f32 %v2865_v11, %v4360_v3  ;;  %v2868_v43 = vadd.f32 %v2867_v33, %v2866_v12 }
 0x1f1   : > { %v2956_v58 = vadd.f32 %v2955_v53, %v2954_v44 }
 0x1f2   : > { %v1635_v20 = vadd.f32 %v2868_v43, %v4363_v50  ;;  %v4433_v54 = vadd.f32 %v2953_v42, %v1632_v49 }
 0x1f4   : > { %v2869_v47 = vpop.f32.mrb[56].mxu0  ;;  %v4435_v21 = vadd.f32 %v2956_v58, %v1635_v20 }
 0x1f5   : > { %v2957_v60 = vpop.f32.mrb[56].mxu1  ;;  %v2870_v41 = vpop.f32.mrb[57].mxu0 }
 0x1f6   : > { %v2958_v26 = vpop.f32.mrb[57].mxu1  ;;  %v2871_v29 = vadd.f32 %v2870_v41, %v2869_v47  ;;  %v2872_v48 = vpop.f32.mrb[58].mxu0 }
 0x1f7   : > { %v2959_v39 = vadd.f32 %v2958_v26, %v2957_v60  ;;  %v2960_v13 = vpop.f32.mrb[58].mxu1  ;;  %v2873_v14 = vpop.f32.mrb[59].mxu0 }
 0x1f8   : > { %v2961_v8 = vpop.f32.mrb[59].mxu1  ;;  %v1640_v3 = vadd.f32 %v2871_v29, %v4366_v37  ;;  %v2874_v57 = vadd.f32 %v2873_v14, %v2872_v48 }
 0x1f9   : > { %v2962_v2 = vadd.f32 %v2961_v8, %v2960_v13 }
 0x1fa   : > { %v1643_v50 = vadd.f32 %v2874_v57, %v4369_v25  ;;  %v4439_v0 = vadd.f32 %v2959_v39, %v1640_v3 }
 0x1fc   : > { %v2875_v34 = vpop.f32.mrb[60].mxu0  ;;  %v4441_v5 = vadd.f32 %v2962_v2, %v1643_v50 }
 0x1fd   : > { %v2963_v59 = vpop.f32.mrb[60].mxu1  ;;  %v2876_v15 = vpop.f32.mrb[61].mxu0 }
 0x1fe   : > { %v2964_v22 = vpop.f32.mrb[61].mxu1  ;;  %v2877_v63 = vadd.f32 %v2876_v15, %v2875_v34  ;;  %v2878_v32 = vpop.f32.mrb[62].mxu0 }
 0x1ff   : > { %v2965_v19 = vadd.f32 %v2964_v22, %v2963_v59  ;;  %v2966_v27 = vpop.f32.mrb[62].mxu1  ;;  %v2879_v31 = vpop.f32.mrb[63].mxu0 }
 0x200   : > { %v2967_v36 = vpop.f32.mrb[63].mxu1  ;;  %v1648_v37 = vadd.f32 %v2877_v63, %v4372_v7  ;;  %v2880_v30 = vadd.f32 %v2879_v31, %v2878_v32 }
 0x201   : > { %v2968_v24 = vadd.f32 %v2967_v36, %v2966_v27 }
 0x202   : > { %v1651_v25 = vadd.f32 %v2880_v30, %v4375_v4  ;;  %v4445_v18 = vadd.f32 %v2965_v19, %v1648_v37 }
 0x204   : > { %v2881_v58 = vpop.f32.mrb[64].mxu0  ;;  %v4447_v12 = vadd.f32 %v2968_v24, %v1651_v25 }
 0x205   : > { %v2969_v42 = vpop.f32.mrb[64].mxu1  ;;  %v2882_v33 = vpop.f32.mrb[65].mxu0 }
 0x206   : > { %v2970_v44 = vpop.f32.mrb[65].mxu1  ;;  %v2883_v43 = vadd.f32 %v2882_v33, %v2881_v58  ;;  %v2884_v60 = vpop.f32.mrb[66].mxu0 }
 0x207   : > { %v2971_v53 = vadd.f32 %v2970_v44, %v2969_v42  ;;  %v2972_v61 = vpop.f32.mrb[66].mxu1  ;;  %v2885_v20 = vpop.f32.mrb[67].mxu0 }
 0x208   : > { %v2973_v11 = vpop.f32.mrb[67].mxu1  ;;  %v1656_v7 = vadd.f32 %v2883_v43, %v4378_v55  ;;  %v2886_v26 = vadd.f32 %v2885_v20, %v2884_v60 }
 0x209   : > { %v2974_v49 = vadd.f32 %v2973_v11, %v2972_v61 }
 0x20a   : > { %v1659_v4 = vadd.f32 %v2886_v26, %v4381_v35  ;;  %v4451_v47 = vadd.f32 %v2971_v53, %v1656_v7 }
 0x20c   : > { %v2887_v2 = vpop.f32.mrb[68].mxu0  ;;  %v4453_v48 = vadd.f32 %v2974_v49, %v1659_v4 }
 0x20d   : > { %v2975_v39 = vpop.f32.mrb[68].mxu1  ;;  %v2888_v14 = vpop.f32.mrb[69].mxu0 }
 0x20e   : > { %v2976_v13 = vpop.f32.mrb[69].mxu1  ;;  %v2889_v57 = vadd.f32 %v2888_v14, %v2887_v2  ;;  %v2890_v59 = vpop.f32.mrb[70].mxu0 }
 0x20f   : > { %v2977_v8 = vadd.f32 %v2976_v13, %v2975_v39  ;;  %v2978_v41 = vpop.f32.mrb[70].mxu1  ;;  %v2891_v50 = vpop.f32.mrb[71].mxu0 }
 0x210   : > { %v2979_v29 = vpop.f32.mrb[71].mxu1  ;;  %v1664_v55 = vadd.f32 %v2889_v57, %v4384_v28  ;;  %v2892_v22 = vadd.f32 %v2891_v50, %v2890_v59 }
 0x211   : > { %v2980_v3 = vadd.f32 %v2979_v29, %v2978_v41 }
 0x212   : > { %v1667_v35 = vadd.f32 %v2892_v22, %v4387_v1  ;;  %v4457_v34 = vadd.f32 %v2977_v8, %v1664_v55 }
 0x214   : > { %v2893_v24 = vpop.f32.mrb[72].mxu0  ;;  %v4459_v32 = vadd.f32 %v2980_v3, %v1667_v35 }
 0x215   : > { %v2981_v19 = vpop.f32.mrb[72].mxu1  ;;  %v2894_v31 = vpop.f32.mrb[73].mxu0 }
 0x216   : > { %v2982_v27 = vpop.f32.mrb[73].mxu1  ;;  %v2895_v30 = vadd.f32 %v2894_v31, %v2893_v24  ;;  %v2896_v42 = vpop.f32.mrb[74].mxu0 }
 0x217   : > { %v2983_v36 = vadd.f32 %v2982_v27, %v2981_v19  ;;  %v2984_v15 = vpop.f32.mrb[74].mxu1  ;;  %v2897_v25 = vpop.f32.mrb[75].mxu0 }
 0x218   : > { %v2985_v63 = vpop.f32.mrb[75].mxu1  ;;  %v1672_v28 = vadd.f32 %v2895_v30, %v4390_v46  ;;  %v2898_v44 = vadd.f32 %v2897_v25, %v2896_v42 }
 0x219   : > { %v2986_v37 = vadd.f32 %v2985_v63, %v2984_v15 }
 0x21a   : > { %v1675_v1 = vadd.f32 %v2898_v44, %v4393_v16  ;;  %v4463_v58 = vadd.f32 %v2983_v36, %v1672_v28 }
 0x21c   : > { %v2899_v49 = vpop.f32.mrb[76].mxu0  ;;  %v4465_v60 = vadd.f32 %v2986_v37, %v1675_v1 }
 0x21d   : > { %v2987_v53 = vpop.f32.mrb[76].mxu1  ;;  %v2900_v20 = vpop.f32.mrb[77].mxu0 }
 0x21e   : > { %v2988_v61 = vpop.f32.mrb[77].mxu1  ;;  %v2901_v26 = vadd.f32 %v2900_v20, %v2899_v49  ;;  %v2902_v39 = vpop.f32.mrb[78].mxu0 }
 0x21f   : > { %v2989_v11 = vadd.f32 %v2988_v61, %v2987_v53  ;;  %v2990_v33 = vpop.f32.mrb[78].mxu1  ;;  %v2903_v4 = vpop.f32.mrb[79].mxu0 }
 0x220   : > { %v2991_v43 = vpop.f32.mrb[79].mxu1  ;;  %v1680_v46 = vadd.f32 %v2901_v26, %v4396_v45  ;;  %v2904_v13 = vadd.f32 %v2903_v4, %v2902_v39 }
 0x221   : > { %v2992_v7 = vadd.f32 %v2991_v43, %v2990_v33 }
 0x222   : > { %v1683_v16 = vadd.f32 %v2904_v13, %v4399_v38  ;;  %v4469_v2 = vadd.f32 %v2989_v11, %v1680_v46 }
 0x224   : > { %v2905_v3 = vpop.f32.mrb[80].mxu0  ;;  %v4471_v59 = vadd.f32 %v2992_v7, %v1683_v16 }
 0x225   : > { %v2993_v8 = vpop.f32.mrb[80].mxu1  ;;  %v2906_v50 = vpop.f32.mrb[81].mxu0 }
 0x226   : > { %v2994_v41 = vpop.f32.mrb[81].mxu1  ;;  %v2907_v22 = vadd.f32 %v2906_v50, %v2905_v3  ;;  %v2908_v19 = vpop.f32.mrb[82].mxu0 }
 0x227   : > { %v2995_v29 = vadd.f32 %v2994_v41, %v2993_v8  ;;  %v2996_v14 = vpop.f32.mrb[82].mxu1  ;;  %v2909_v35 = vpop.f32.mrb[83].mxu0 }
 0x228   : > { %v2997_v57 = vpop.f32.mrb[83].mxu1  ;;  %v1688_v45 = vadd.f32 %v2907_v22, %v4402_v23  ;;  %v2910_v27 = vadd.f32 %v2909_v35, %v2908_v19 }
 0x229   : > { %v2998_v55 = vadd.f32 %v2997_v57, %v2996_v14 }
 0x22a   : > { %v1691_v38 = vadd.f32 %v2910_v27, %v4405_v52  ;;  %v4475_v24 = vadd.f32 %v2995_v29, %v1688_v45 }
 0x22c   : > { %v2911_v37 = vpop.f32.mrb[84].mxu0  ;;  %v4477_v42 = vadd.f32 %v2998_v55, %v1691_v38 }
 0x22d   : > { %v2999_v36 = vpop.f32.mrb[84].mxu1  ;;  %v2912_v25 = vpop.f32.mrb[85].mxu0 }
 0x22e   : > { %v3000_v15 = vpop.f32.mrb[85].mxu1  ;;  %v2913_v44 = vadd.f32 %v2912_v25, %v2911_v37  ;;  %v2914_v53 = vpop.f32.mrb[86].mxu0 }
 0x22f   : > { %v3001_v63 = vadd.f32 %v3000_v15, %v2999_v36  ;;  %v3002_v31 = vpop.f32.mrb[86].mxu1  ;;  %v2915_v1 = vpop.f32.mrb[87].mxu0 }
 0x230   : > { %v3003_v30 = vpop.f32.mrb[87].mxu1  ;;  %v1696_v23 = vadd.f32 %v2913_v44, %v4408_v10  ;;  %v2916_v61 = vadd.f32 %v2915_v1, %v2914_v53 }
 0x231   : > { %v3004_v28 = vadd.f32 %v3003_v30, %v3002_v31 }
 0x232   : > { %v1699_v52 = vadd.f32 %v2916_v61, %v4411_v56  ;;  %v1825_v49 = vadd.f32 %v3001_v63, %v1696_v23 }
 0x234   : > { %v2917_v7 = vpop.f32.mrb[88].mxu0  ;;  %v4481_v39 = vadd.f32 %v3004_v28, %v1699_v52 }
 0x235   : > { %v3005_v11 = vpop.f32.mrb[88].mxu1  ;;  %v2918_v4 = vpop.f32.mrb[89].mxu0 }
 0x236   : > { %v3006_v33 = vpop.f32.mrb[89].mxu1  ;;  %v2919_v13 = vadd.f32 %v2918_v4, %v2917_v7  ;;  %v2920_v8 = vpop.f32.mrb[90].mxu0 }
 0x237   : > { %v3007_v43 = vadd.f32 %v3006_v33, %v3005_v11  ;;  %v3008_v20 = vpop.f32.mrb[90].mxu1  ;;  %v2921_v16 = vpop.f32.mrb[91].mxu0 }
 0x238   : > { %v3009_v26 = vpop.f32.mrb[91].mxu1  ;;  %v1704_v41 = vadd.f32 %v2919_v13, %v4414_v17  ;;  %v2922_v10 = vadd.f32 %v2921_v16, %v2920_v8 }
 0x239   : > { %v3010_v46 = vadd.f32 %v3009_v26, %v3008_v20 }
 0x23a   : > { %v1707_v14 = vadd.f32 %v2922_v10, %v4417_v6  ;;  %v4485_v3 = vadd.f32 %v3007_v43, %v1704_v41 }
 0x23c   : > { %v2923_v55 = vpop.f32.mrb[92].mxu0  ;;  %v4487_v19 = vadd.f32 %v3010_v46, %v1707_v14 }
 0x23d   : > { %v3011_v29 = vpop.f32.mrb[92].mxu1  ;;  %v2924_v35 = vpop.f32.mrb[93].mxu0 }
 0x23e   : > { %v3012_v56 = vpop.f32.mrb[93].mxu1  ;;  %v2925_v27 = vadd.f32 %v2924_v35, %v2923_v55  ;;  %v2926_v36 = vpop.f32.mrb[94].mxu0 }
 0x23f   : > { %v3013_v57 = vadd.f32 %v3012_v56, %v3011_v29  ;;  %v3014_v50 = vpop.f32.mrb[94].mxu1  ;;  %v2927_v38 = vpop.f32.mrb[95].mxu0 }
 0x240   : > { %v3015_v22 = vpop.f32.mrb[95].mxu1  ;;  %v1712_v17 = vadd.f32 %v2925_v27, %v4420_v9  ;;  %v2928_v15 = vadd.f32 %v2927_v38, %v2926_v36 }
 0x241   : > { %v3016_v45 = vadd.f32 %v3015_v22, %v3014_v50 }
 0x242   : > { %v1715_v6 = vadd.f32 %v2928_v15, %v4423_v40  ;;  %v1841_v30 = vadd.f32 %v3013_v57, %v1712_v17 }
 0x244   : > { %v3055_v44 = vpop.f32.mrb[96].mxu0  ;;  %v4501_v23 = vadd.f32 %v3016_v45, %v1715_v6 }
 0x245   : > { %v3067_v63 = vpop.f32.mrb[96].mxu1  ;;  %v4504_v40 = vadd.f32 %v3055_v44, %v4433_v54 }
 0x246   : > { %v4492_v31 = vadd.f32 %v3067_v63, %v4469_v2  ;;  %v1929_v37 = vpop.f32.mrb[97].mxu1  ;;  %v1881_v2 = vpop.f32.mrb[97].mxu0 }
 0x247   : > { %v4495_v25 = vadd.f32 %v1929_v37, %v4463_v58  ;;  %v3068_v28 = vpop.f32.mrb[98].mxu1  ;;  %v4511_v58 = vadd.f32 %v1881_v2, %v4427_v51  ;;  %v3056_v52 = vpop.f32.mrb[98].mxu0  ;;  %v2516_v33 = vmul.f32 -1.442695, %v4504_v40 }
 0x248   : > { %v2528_v53 = vmul.f32 -1.442695, %v4492_v31  ;;  %v4499_v1 = vadd.f32 %v3068_v28, %v4471_v59  ;;  %v1932_v9 = vpop.f32.mrb[99].mxu1  ;;  %v4516_v43 = vadd.f32 %v3056_v52, %v4435_v21  ;;  %v1884_v54 = vpop.f32.mrb[99].mxu0 }
 0x249   : > { %v2526_v61 = vmul.f32 -1.442695, %v4495_v25  ;;  %v4508_v11 = vadd.f32 %v1932_v9, %v4465_v60  ;;  %v2514_v20 = vmul.f32 -1.442695, %v4511_v58  ;;  %v4520_v60 = vadd.f32 %v1884_v54, %v4429_v62 }
 0x24a   : > { %3304 = vpow2.f32 %v2528_v53  ;;  %v2529_v59 = vmul.f32 -1.442695, %v4499_v1  ;;  %v2517_v51 = vmul.f32 -1.442695, %v4516_v43 }
 0x24b   : > { %3306 = vpow2.f32 %v2526_v61  ;;  %v2527_v7 = vmul.f32 -1.442695, %v4508_v11  ;;  %v2515_v4 = vmul.f32 -1.442695, %v4520_v60 }
 0x24c   : > { %3308 = vpow2.f32 %v2529_v59  ;;  %v3059_v62 = vpop.f32.mrb[100].mxu0 }
 0x24d   : > { %3310 = vpow2.f32 %v2516_v33  ;;  %v3071_v26 = vpop.f32.mrb[100].mxu1  ;;  %v4535_v29 = vadd.f32 %v3059_v62, %v4445_v18 }
 0x24e   : > { %3312 = vpow2.f32 %v2514_v20  ;;  %v4525_v46 = vadd.f32 %v3071_v26, %v1825_v49  ;;  %v1945_v21 = vpop.f32.mrb[101].mxu1  ;;  %v1897_v49 = vpop.f32.mrb[101].mxu0 }
 0x24f   : > { %3314 = vpow2.f32 %v2517_v51  ;;  %v4528_v13 = vadd.f32 %v1945_v21, %v4475_v24  ;;  %v3072_v8 = vpop.f32.mrb[102].mxu1  ;;  %v4541_v24 = vadd.f32 %v1897_v49, %v4439_v0  ;;  %v3060_v56 = vpop.f32.mrb[102].mxu0  ;;  %v2520_v50 = vmul.f32 -1.442695, %v4535_v29 }
 0x250   : > { %3316 = vpow2.f32 %v2515_v4  ;;  %v2532_v16 = vmul.f32 -1.442695, %v4525_v46  ;;  %v4532_v41 = vadd.f32 %v3072_v8, %v4481_v39  ;;  %v1948_v10 = vpop.f32.mrb[103].mxu1  ;;  %v4546_v39 = vadd.f32 %v3060_v56, %v4447_v12  ;;  %v1900_v55 = vpop.f32.mrb[103].mxu0 }
 0x251   : > { %3318 = vpow2.f32 %v2527_v7  ;;  %v4538_v14 = vadd.f32 %v1948_v10, %v4477_v42  ;;  %v4549_v18 = vadd.f32 %v1900_v55, %v4441_v5  ;;  %v2530_v26 = vmul.f32 -1.442695, %v4528_v13 }
 0x252   : > { %3320 = vpow2.f32 %v2532_v16  ;;  %v2533_v57 = vmul.f32 -1.442695, %v4532_v41 }
 0x253   : > { %v2519_v56 = vmul.f32 -1.442695, %v4549_v18 }
 0x254   : > { %v3305_v22 = vpop.eup %3304  ;;  %3322 = vpow2.f32 %v2533_v57  ;;  %v3063_v5 = vpop.f32.mrb[104].mxu0  ;;  %v2531_v57 = vmul.f32 -1.442695, %v4538_v14 }
 0x255   : > { %v3307_v42 = vpop.eup %3306  ;;  %v2062_v35 = vadd.f32 1.0, %v3305_v22  ;;  %3324 = vpow2.f32 %v2520_v50  ;;  %v3075_v45 = vpop.f32.mrb[104].mxu1 }
 0x256   : > { %v3309_v0 = vpop.eup %3308  ;;  %v2060_v27 = vadd.f32 1.0, %v3307_v42  ;;  %v4551_v36 = vadd.f32 %v3075_v45, %v1841_v30  ;;  %v1961_v38 = vpop.f32.mrb[105].mxu1  ;;  %v4560_v30 = vadd.f32 %v3063_v5, %v4457_v34 }
 0x257   : > { %v3311_v17 = vpop.eup %3310  ;;  %3326 = vrcp.f32 %v2062_v35  ;;  %v2063_v15 = vadd.f32 1.0, %v3309_v0  ;;  %v4554_v12 = vadd.f32 %v1961_v38, %v4485_v3  ;;  %v3076_v63 = vpop.f32.mrb[106].mxu1 }
 0x258   : > { %v3313_v6 = vpop.eup %3312  ;;  %v2050_v37 = vadd.f32 1.0, %v3311_v17  ;;  %3328 = vrcp.f32 %v2060_v27  ;;  %v4557_v28 = vadd.f32 %v3076_v63, %v4501_v23  ;;  %v1964_v44 = vpop.f32.mrb[107].mxu1  ;;  %v2518_v23 = vmul.f32 -1.442695, %v4541_v24 }
 0x259   : > { %v3315_v53 = vpop.eup %3314  ;;  %v2048_v9 = vadd.f32 1.0, %v3313_v6  ;;  %3330 = vrcp.f32 %v2063_v15  ;;  %v1913_v2 = vpop.f32.mrb[105].mxu0  ;;  %v4575_v21 = vadd.f32 %v1964_v44, %v4487_v19  ;;  %v2524_v19 = vmul.f32 -1.442695, %v4560_v30 }
 0x25a   : > { %v3317_v61 = vpop.eup %3316  ;;  %3332 = vrcp.f32 %v2050_v37  ;;  %v2051_v3 = vadd.f32 1.0, %v3315_v53  ;;  %v4563_v52 = vadd.f32 %v1913_v2, %v4451_v47  ;;  %v3064_v59 = vpop.f32.mrb[106].mxu0  ;;  %v2521_v47 = vmul.f32 -1.442695, %v4546_v39 }
 0x25b   : > { %v3319_v33 = vpop.eup %3318  ;;  %3334 = vrcp.f32 %v2048_v9  ;;  %v2049_v54 = vadd.f32 1.0, %v3317_v61  ;;  %v4567_v20 = vadd.f32 %v3064_v59, %v4459_v32  ;;  %v1916_v51 = vpop.f32.mrb[107].mxu0  ;;  %v2536_v35 = vmul.f32 -1.442695, %v4551_v36 }
 0x25c   : > { %v3321_v7 = vpop.eup %3320  ;;  %3336 = vrcp.f32 %v2051_v3  ;;  %v2061_v34 = vadd.f32 1.0, %v3319_v33  ;;  %v4571_v4 = vadd.f32 %v1916_v51, %v4453_v48  ;;  %v2522_v0 = vmul.f32 -1.442695, %v4563_v52 }
 0x25d   : > { %3338 = vrcp.f32 %v2049_v54  ;;  %v2066_v62 = vadd.f32 1.0, %v3321_v7  ;;  %v2534_v17 = vmul.f32 -1.442695, %v4554_v12  ;;  %v2537_v15 = vmul.f32 -1.442695, %v4557_v28 }
 0x25e   : > { %v3323_v8 = vpop.eup %3322  ;;  %3340 = vrcp.f32 %v2061_v34  ;;  %v2525_v6 = vmul.f32 -1.442695, %v4567_v20  ;;  %v2523_v53 = vmul.f32 -1.442695, %v4571_v4 }
 0x25f   : > { %v3325_v32 = vpop.eup %3324  ;;  %3342 = vpow2.f32 %v2518_v23  ;;  %v2067_v10 = vadd.f32 1.0, %v3323_v8 }
 0x260   : > { %v2054_v16 = vadd.f32 1.0, %v3325_v32  ;;  %3344 = vpow2.f32 %v2530_v26 }
 0x261   : > { %v3327_v49 = vpop.eup %3326  ;;  %3346 = vpow2.f32 %v2521_v47 }
 0x262   : > { %v3329_v48 = vpop.eup %3328  ;;  %3348 = vrcp.f32 %v2066_v62  ;;  %v2134_v22 = vmul.f32 %v3327_v49, %v4492_v31 }
 0x263   : > { %v3331_v50 = vpop.eup %3330  ;;  %3350 = vrcp.f32 %v2054_v16  ;;  %v2132_v2 = vmul.f32 %v3329_v48, %v4495_v25 }
 0x264   : > { %v3333_v55 = vpop.eup %3332  ;;  %v2135_v42 = vmul.f32 %v3331_v50, %v4499_v1  ;;  %3352 = vrcp.f32 %v2067_v10 }
 0x265   : > { %v3335_v45 = vpop.eup %3334  ;;  %3354 = vpow2.f32 %v2519_v56  ;;  %v2122_v31 = vmul.f32 %v3333_v55, %v4504_v40 }
 0x266   : > { %v3337_v27 = vpop.eup %3336  ;;  %v2632_v38 = vpack.c.bf16 %v2135_v42, %v2134_v22  ;;  %3356 = vpow2.f32 %v2531_v57  ;;  %v2120_v5 = vmul.f32 %v3335_v45, %v4511_v58 }
 0x267   : > { %v3339_v63 = vpop.eup %3338  ;;  %v2123_v1 = vmul.f32 %v3337_v27, %v4516_v43  ;;  %3358 = vpow2.f32 %v2524_v19 }
 0x268   : > { %v3341_v37 = vpop.eup %3340  ;;  %2660 = vst [vmem:[%s3828_s25 + $0x38] sm:$0xff] %v2632_v38   ;;  %v2121_v44 = vmul.f32 %v3339_v63, %v4520_v60  ;;  %3360 = vpow2.f32 %v2536_v35  ;;  %v2535_v60 = vmul.f32 -1.442695, %v4575_v21 }
 0x269   : > { %v3343_v9 = vpop.eup %3342  ;;  %v2602_v40 = vpack.c.bf16 %v2123_v1, %v2122_v31  ;;  %v2133_v43 = vmul.f32 %v3341_v37, %v4508_v11  ;;  %3362 = vpow2.f32 %v2522_v0 }
 0x26a   : > { %v3345_v61 = vpop.eup %3344  ;;  %v2597_v3 = vpack.c.bf16 %v2121_v44, %v2120_v5  ;;  %3364 = vpow2.f32 %v2534_v17  ;;  %v2052_v54 = vadd.f32 1.0, %v3343_v9 }
 0x26b   : > { %v3347_v59 = vpop.eup %3346  ;;  %2654 = vst [vmem:[%s3828_s25 + $0x8] sm:$0xff] %v2602_v40   ;;  %v2627_v58 = vpack.c.bf16 %v2133_v43, %v2132_v2  ;;  %3366 = vpow2.f32 %v2525_v6  ;;  %v2064_v51 = vadd.f32 1.0, %v3345_v61 }
 0x26c   : > { %v3349_v33 = vpop.eup %3348  ;;  %2598 = vst [vmem:[%s3828_s25] sm:$0xff] %v2597_v3   ;;  %v2055_v23 = vadd.f32 1.0, %v3347_v59  ;;  %3368 = vpow2.f32 %v2537_v15 }
 0x26d   : > { %v3351_v25 = vpop.eup %3350  ;;  %2659 = vst [vmem:[%s3828_s25 + $0x30] sm:$0xff] %v2627_v58   ;;  %3370 = vpow2.f32 %v2523_v53  ;;  %v2138_v34 = vmul.f32 %v3349_v33, %v4525_v46 }
 0x26e   : > { %v3353_v11 = vpop.eup %3352  ;;  %3372 = vrcp.f32 %v2055_v23  ;;  %v2126_v27 = vmul.f32 %v3351_v25, %v4535_v29 }
 0x26f   : > { %v3355_v7 = vpop.eup %3354  ;;  %v2139_v26 = vmul.f32 %v3353_v11, %v4532_v41  ;;  %3374 = vpow2.f32 %v2535_v60 }
 0x270   : > { %v3357_v47 = vpop.eup %3356  ;;  %3376 = vrcp.f32 %v2052_v54  ;;  %v2053_v8 = vadd.f32 1.0, %v3355_v7 }
 0x271   : > { %v3359_v62 = vpop.eup %3358  ;;  %3378 = vrcp.f32 %v2064_v51  ;;  %v2642_v32 = vpack.c.bf16 %v2139_v26, %v2138_v34  ;;  %v2065_v16 = vadd.f32 1.0, %v3357_v47 }
 0x272   : > { %v3361_v10 = vpop.eup %3360  ;;  %3380 = vrcp.f32 %v2053_v8  ;;  %v2058_v49 = vadd.f32 1.0, %v3359_v62 }
 0x273   : > { %v3363_v56 = vpop.eup %3362  ;;  %2662 = vst [vmem:[%s3828_s25 + $0x48] sm:$0xff] %v2642_v32   ;;  %3382 = vrcp.f32 %v2065_v16  ;;  %v2070_v48 = vadd.f32 1.0, %v3361_v10 }
 0x274   : > { %v3365_v57 = vpop.eup %3364  ;;  %3384 = vrcp.f32 %v2058_v49  ;;  %v2056_v46 = vadd.f32 1.0, %v3363_v56 }
 0x275   : > { %v3367_v50 = vpop.eup %3366  ;;  %3386 = vrcp.f32 %v2070_v48  ;;  %v2068_v41 = vadd.f32 1.0, %v3365_v57 }
 0x276   : > { %v3369_v19 = vpop.eup %3368  ;;  %3388 = vrcp.f32 %v2056_v46  ;;  %v2059_v55 = vadd.f32 1.0, %v3367_v50 }
 0x277   : > { %v3371_v22 = vpop.eup %3370  ;;  %3390 = vrcp.f32 %v2068_v41  ;;  %v2071_v42 = vadd.f32 1.0, %v3369_v19 }
 0x278   : > { %v3373_v35 = vpop.eup %3372  ;;  %3392 = vrcp.f32 %v2059_v55  ;;  %v2057_v45 = vadd.f32 1.0, %v3371_v22 }
 0x279   : > { %v3375_v0 = vpop.eup %3374  ;;  %v2127_v38 = vmul.f32 %v3373_v35, %v4546_v39  ;;  %3394 = vrcp.f32 %v2071_v42 }
 0x27a   : > { %v3377_v17 = vpop.eup %3376  ;;  %3396 = vrcp.f32 %v2057_v45  ;;  %v2069_v15 = vadd.f32 1.0, %v3375_v0 }
 0x27b   : > { %v3379_v63 = vpop.eup %3378  ;;  %v2612_v31 = vpack.c.bf16 %v2127_v38, %v2126_v27  ;;  %v2124_v37 = vmul.f32 %v3377_v17, %v4541_v24 }
 0x27c   : > { %v3381_v1 = vpop.eup %3380  ;;  %3398 = vrcp.f32 %v2069_v15  ;;  %v2136_v39 = vmul.f32 %v3379_v63, %v4528_v13 }
 0x27d   : > { %v3383_v6 = vpop.eup %3382  ;;  %2656 = vst [vmem:[%s3828_s25 + $0x18] sm:$0xff] %v2612_v31   ;;  %v2125_v5 = vmul.f32 %v3381_v1, %v4549_v18 }
 0x27e   : > { %v3385_v29 = vpop.eup %3384  ;;  %v2137_v44 = vmul.f32 %v3383_v6, %v4538_v14 }
 0x27f   : > { %v3387_v53 = vpop.eup %3386  ;;  %v2607_v9 = vpack.c.bf16 %v2125_v5, %v2124_v37  ;;  %v2130_v18 = vmul.f32 %v3385_v29, %v4560_v30 }
 0x280   : > { %v3389_v2 = vpop.eup %3388  ;;  %v2637_v40 = vpack.c.bf16 %v2137_v44, %v2136_v39  ;;  %v2142_v14 = vmul.f32 %v3387_v53, %v4551_v36 }
 0x281   : > { %v3391_v43 = vpop.eup %3390  ;;  %2655 = vst [vmem:[%s3828_s25 + $0x10] sm:$0xff] %v2607_v9   ;;  %v2128_v58 = vmul.f32 %v3389_v2, %v4563_v52 }
 0x282   : > { %v3393_v61 = vpop.eup %3392  ;;  %2661 = vst [vmem:[%s3828_s25 + $0x40] sm:$0xff] %v2637_v40  }
 0x283   : > { %v3395_v24 = vpop.eup %3394  ;;  %v2131_v13 = vmul.f32 %v3393_v61, %v4567_v20  ;;  %v2140_v20 = vmul.f32 %v3391_v43, %v4554_v12 }
 0x284   : > { %v3397_v3 = vpop.eup %3396  ;;  %v2143_v59 = vmul.f32 %v3395_v24, %v4557_v28 }
 0x285   : > { %v2622_v60 = vpack.c.bf16 %v2131_v13, %v2130_v18  ;;  %v2129_v33 = vmul.f32 %v3397_v3, %v4571_v4 }
 0x286   : > { %v3399_v30 = vpop.eup %3398  ;;  %v2652_v54 = vpack.c.bf16 %v2143_v59, %v2142_v14 }
 0x287   : > { %2658 = vst [vmem:[%s3828_s25 + $0x28] sm:$0xff] %v2622_v60   ;;  %v2617_v23 = vpack.c.bf16 %v2129_v33, %v2128_v58  ;;  %v2141_v36 = vmul.f32 %v3399_v30, %v4575_v21 }
 0x288   : > { %2664 = vst [vmem:[%s3828_s25 + $0x58] sm:$0xff] %v2652_v54  }
 0x289   : > { %2657 = vst [vmem:[%s3828_s25 + $0x20] sm:$0xff] %v2617_v23   ;;  %v2647_v28 = vpack.c.bf16 %v2141_v36, %v2140_v20 }
 0x28b   : > { %2663 = vst [vmem:[%s3828_s25 + $0x50] sm:$0xff] %v2647_v28  }
 0x28c   : > { %3525 = shalt.err (!%p3522_p10)
}
 0x28d   : > { %s3526_s25 = scalar_lea.hbm %s4627_s29, 1536  ;;  %s3530_s8 = scalar_lea.hbm %s4690_s3, 6144 }
 0x28e   : > { %p3527_p12 = scmp.ne.s32.totalorder %s4627_s29, %s3526_s25  ;;  %p3531_p2 = scmp.lt.u32.totalorder %s4627_s29, %s4690_s3 }
 0x28f   : > { %p3532_p6 = scmp.lt.u32.totalorder %s3530_s8, %s3526_s25  ;;  %p3534_p4 = scmp.lt.u32.totalorder %s3526_s25, %s4627_s29 }
 0x290   : > { %p3528_p1 = pnand %p3527_p12, %p4735_p7 }
 0x291   : > { %p3533_p9 = por %p3532_p6, %p3531_p2 }
 0x292   : > { %p3529_p5 = pneg %p3528_p1 }
 0x293   : > { %p3535_p11 = por %p3534_p4, %p3533_p9 }
 0x295   : > { %p3536_p13 = pnand %p3535_p11, %p3529_p5 }
 0x297   : > { %3539 = shalt.err (!%p3536_p13)
}
 0x298   : > { %s3624_s18 = smov 64   ;;  %s3625_s7 = smov 4  }
 0x299   : > { %3108 = dma.vmem_to_hbm [thread:$0]  (%p4735_p7), %s4629_s16, 1536, %s4627_s29, %s4635_s23, %s3624_s18, %s3624_s18, %s3625_s7  }
 0x29a PF: > { %p3127_p3 = scmp.ge.s32.totalorder %s3616_s19, 2  ;;  %s2295_s15 = sand.u32 1, %s3588_s12  }
 0x29b   : > { %p4736_p8 = scmp.ne.s32.totalorder %s4711_s27, 0  ;;  %s2296_s9 = scalar_lea.sflag [#allocation6], %s2295_s15 }
 0x29d   : > { %p3118_p0 = pnand %p3127_p3, %p4736_p8 }
 0x29f   : > { %3583 = dma.done.wait (!%p3118_p0), %s2296_s9, 1536  }
 0x2a0   : > { %3585 = vsyncadd (!%p3118_p0), %s2296_s9, 4294965760  ;;  %s18_s19 = sadd.s32 1, %s3616_s19   ;;  %s4737_s16 = sld [smem:[#allocation20_spill]] }
 0x2a1   : > { %p15_p10 = scmp.ge.s32.totalorder %s18_s19, 6   ;;  %s4738_s26 = sld [smem:[#allocation21_spill]] }
 0x2a2   : > { %s4739_s18 = sld [smem:[#allocation22_spill]]  ;;  %s4740_s12 = smov %s3592_s13 }
 0x2a3   : > { %s4741_s13 = smov %s3596_s14  ;;  %s4742_s14 = smov %s3725_s5 }
 0x2a4   : > { %s4743_s15 = smov %s3608_s17  ;;  %17 = sbr.rel (!%p15_p10) target bundleno = 7 (0x7), region = 92 }
 0x2a7   : > { %s4744_s17 = smov %s4738_s26 }
 0x2ab   :  { %2301 = vsyncpa [#allocation5], 1 }
 0x2ac   :  { %2303 = vsyncpa [#allocation5 + $0x1], 1 }
 0x2ad   :  { %2304 = vsyncpa [#allocation8], 1 }
 0x2ae   :  { %2305 = vsyncpa [#allocation6], 1 }
 0x2af   :  { %2307 = vsyncpa [#allocation6 + $0x1], 1 }
 0x2b0   :  { %2308 = vsyncmov [#allocation3] }
 0x2b3   :  { %s2309_s27 = vpop.sfrf %2308 }
 0x2b4   :  { %p2565_p7 = scmp.ne.s32.totalorder %s2309_s27, 0 }
 0x2b6   :  { %2313 = shalt.err (%p2565_p7)  }
 0x2b7   :  { %2315 = vsyncmov [#allocation3 + $0x1] }
 0x2ba   :  { %s2316_s5 = vpop.sfrf %2315 }
 0x2bb   :  { %p2566_p12 = scmp.ne.s32.totalorder %s2316_s5, 0 }
 0x2bd   :  { %2320 = shalt.err (%p2566_p12)  }

</bundles_post_ra>
